<compile_context>
chip_gen: v7x
topology: tpu7x:2x2x1
jax: 0.10.0
libtpu: 0.0.40
codegen_flags: <defaults>
</compile_context>

<pallas_src>
import jax
import jax.numpy as jnp
import numpy as np
from jax.experimental import pallas as pl
from jax.experimental.pallas import tpu as pltpu

# ---------------------------------------------------------------------------
# Config (maps to Narx / NestedNarx __init__ arguments)
# ---------------------------------------------------------------------------
NX = 3            # n_input_features  (prcp, pet, streamflow)
NY = 1            # n_output_features (streamflow)
HIDDEN = 32       # n_hidden_states
INPUT_DELAY = 2
FEEDBACK_DELAY = 3
NUM_LAYERS = 10
MAX_DELAY = max(INPUT_DELAY, FEEDBACK_DELAY)
IN_FEATURES = (NX - NY) * (INPUT_DELAY + 1) + NY * (FEEDBACK_DELAY + 1)

NT = 96           # long enough that the row grid has >1 block (multi-block path tested)

# Synthetic nested_model: basin_trees[i][j] = list of global basin (column) ids.
# Input column order m follows trees / ascending order j / ascending k, exactly
# as NestedNarx.forward assigns x[:, m, :] to each basin.
BASIN_TREES = [
    [[0], [1, 2]],        # tree 0: outlet + two upstream basins
    [[3], [4, 5], [6]],   # tree 1: three orders
]
N_BASIN = sum(len(order) for tree in BASIN_TREES for order in tree)

LANE_Q = 256      # row padding quantum -> unmasked, lane-dense stores


def _use_bf16_tanh() -> bool:
    """bf16 tanh chain only on chips with a bf16-capable EUP (v6e / v7x)."""
    try:
        kind = jax.devices()[0].device_kind.lower()
    except Exception:
        return False
    return not any(tag in kind for tag in ("v2", "v3", "v4", "v5"))


TANH_BF16 = _use_bf16_tanh()


def _round_up(x, m):
    return ((x + m - 1) // m) * m


def traversal_output_order(basin_trees):
    """Column order in which NestedNarx.forward concatenates per-basin outputs:
    for each tree, orders from highest down to 0, basins within an order in
    reverse index order."""
    perm = []
    for tree in basin_trees:
        for j in range(len(tree) - 1, -1, -1):
            for k in range(len(tree[j]) - 1, -1, -1):
                perm.append(tree[j][k])
    return perm


# ---------------------------------------------------------------------------
# Deterministic parameter init (PyTorch-style uniform(-1/sqrt(fan), 1/sqrt(fan)))
# ---------------------------------------------------------------------------
def init_params(key):
    ks = jax.random.split(key, 7)

    def u(k, shape, fan_in):
        bound = 1.0 / np.sqrt(fan_in)
        return jax.random.uniform(k, shape, jnp.float32, -bound, bound)

    w_in = u(ks[0], (HIDDEN, IN_FEATURES), IN_FEATURES)   # linearIn.weight
    b_in = u(ks[1], (HIDDEN,), IN_FEATURES)               # linearIn.bias
    # The torch module builds [nn.RNNCell(...)] * num_layers -> ONE shared cell.
    # Hidden state is always None (zeros) in Narx.forward, so W_hh never
    # contributes; only b_hh survives -> fold b_ih + b_hh into one bias.
    w_ih = u(ks[2], (HIDDEN, HIDDEN), HIDDEN)
    b_ih = u(ks[3], (HIDDEN,), HIDDEN)
    b_hh = u(ks[4], (HIDDEN,), HIDDEN)
    w_out = u(ks[5], (NY, HIDDEN), HIDDEN)                # linearOut.weight
    b_out = u(ks[6], (NY,), HIDDEN)                       # linearOut.bias
    return dict(w_in=w_in, b_in=b_in, w_ih=w_ih, b_cell=b_ih + b_hh,
                w_out=w_out, b_out=b_out)


# ---------------------------------------------------------------------------
# Delayed-tap input construction
# ---------------------------------------------------------------------------
def _tap_offsets():
    # Torch: x0 = x[t-d : t];  xt = cat(x0[-1], x0[0], ..., x0[d-1])
    # -> time offsets (relative to t): 1, d, d-1, ..., 1
    exo = [1] + [INPUT_DELAY - i for i in range(INPUT_DELAY)]
    fb = [1] + [FEEDBACK_DELAY - i for i in range(FEEDBACK_DELAY)]
    return exo, fb


def build_narx_inputs_feature_major(x):
    """Build the (IN_FEATURES, tv*B) slab directly feature-major so the
    delayed-tap gather, layout, and pad fuse into one XLA pass (no wrapper
    transpose / extra HBM round trip)."""
    nt = x.shape[0]
    exo_off, fb_off = _tap_offsets()
    slabs = []
    for off in exo_off:
        for f in range(NX - NY):
            slabs.append(x[MAX_DELAY - off: nt - off, :, f])        # (tv, B)
    for off in fb_off:
        for f in range(NY):
            slabs.append(x[MAX_DELAY - off: nt - off, :, NX - NY + f])
    xt = jnp.stack(slabs, axis=0)                                    # (F, tv, B)
    return xt.reshape(IN_FEATURES, -1)                               # (F, tv*B)


def build_narx_inputs_ref(x):
    """(tv, B, F) taps in the torch concat order — independent construction,
    used only by the references (cross-checks the feature-major slab)."""
    nt = x.shape[0]
    t_idx = jnp.arange(MAX_DELAY, nt)
    exo_off, fb_off = _tap_offsets()
    exo = [x[t_idx - off, :, : NX - NY] for off in exo_off]
    fb = [x[t_idx - off, :, NX - NY:] for off in fb_off]
    return jnp.concatenate(exo + fb, axis=-1)


# ---------------------------------------------------------------------------
# Pallas kernel: relu(linearIn) -> NUM_LAYERS x tanh(shared RNNCell, hx=None)
#                -> linearOut.   Transposed (rows on lanes) formulation:
#   xt_ref : (IN_FEATURES, RB) bf16   w_in : (H, F) bf16   b_in : (H, 1) f32
#   h      : (HIDDEN, RB)             w_ih : (H, H) bf16   b_cell : (H, 1) f32
#   o_ref  : (NY, RB) f32             w_out: (NY, H) bf16  b_out : (NY, 1) f32
# ---------------------------------------------------------------------------
def _narx_mlp_kernel(xt_ref, w_in_ref, b_in_ref, w_ih_ref, b_cell_ref,
                     w_out_ref, b_out_ref, o_ref):
    # linearIn + relu (bf16 MXU operands, f32 accumulate)
    h = jnp.dot(w_in_ref[...], xt_ref[...], preferred_element_type=jnp.float32)
    h = jnp.maximum(h + b_in_ref[...], 0.0)          # (H, RB) f32
    h = h.astype(jnp.bfloat16)                       # MXU operand dtype

    # Hoisted out of the layer loop: shared weight load.  The (H,1) bias column
    # is added directly each layer (lane broadcast) — no materialized (H,RB).
    w_ih = w_ih_ref[...]                             # (H, H) bf16
    b_cell = b_cell_ref[...]                         # (H, 1) f32
    for _ in range(NUM_LAYERS):                      # stacked shared RNNCell, hx=None
        z = jnp.dot(w_ih, h, preferred_element_type=jnp.float32) + b_cell
        if TANH_BF16:
            h = jnp.tanh(z.astype(jnp.bfloat16))     # bf16 EUP (v6e/v7x)
        else:
            h = jnp.tanh(z).astype(jnp.bfloat16)     # f32 EUP (v5e has no bf16 EUP)

    # linearOut, lane-dense f32 store
    o_ref[...] = (jnp.dot(w_out_ref[...], h, preferred_element_type=jnp.float32)
                  + b_out_ref[...])


def narx_forward(x, params, row_block=4096):
    nt, n_basin, _ = x.shape
    tv = nt - MAX_DELAY
    rows = tv * n_basin

    # Feature-major lane slab: features on sublanes, rows on lanes.
    xt_lane = build_narx_inputs_feature_major(x).astype(jnp.bfloat16)

    # Row blocking: large blocks (default 4096) for low per-step overhead, but
    # keep >= 2 blocks once there is enough work so the "parallel" grid axis
    # can shard across v7x's two TensorCores.
    rows_pad = _round_up(rows, LANE_Q)
    block = min(_round_up(row_block, LANE_Q), rows_pad)
    if rows_pad >= 2 * LANE_Q:
        block = min(block, _round_up(pl.cdiv(rows_pad, 2), LANE_Q))
    rows_pad = _round_up(rows_pad, block)
    grid = (rows_pad // block,)

    xt_lane = jnp.pad(xt_lane, ((0, 0), (0, rows_pad - rows)))

    # bf16 MXU operands; biases stay f32 columns (broadcast along lanes).
    w_in = params["w_in"].astype(jnp.bfloat16)       # (H, F)
    w_ih = params["w_ih"].astype(jnp.bfloat16)       # (H, H)
    w_out = params["w_out"].astype(jnp.bfloat16)     # (NY, H)
    b_in = params["b_in"][:, None]                   # (H, 1)
    b_cell = params["b_cell"][:, None]               # (H, 1)
    b_out = params["b_out"][:, None]                 # (NY, 1)

    cost = pl.CostEstimate(
        flops=2 * rows_pad * (IN_FEATURES * HIDDEN
                              + NUM_LAYERS * HIDDEN * HIDDEN
                              + HIDDEN * NY),
        transcendentals=NUM_LAYERS * HIDDEN * rows_pad,
        bytes_accessed=rows_pad * (IN_FEATURES * 2 + NY * 4)
                       + 2 * (IN_FEATURES * HIDDEN + HIDDEN * HIDDEN + HIDDEN * NY)
                       + 4 * (2 * HIDDEN + 2 * NY),
    )

    y_lane = pl.pallas_call(
        _narx_mlp_kernel,
        out_shape=jax.ShapeDtypeStruct((NY, rows_pad), jnp.float32),
        grid=grid,
        in_specs=[
            pl.BlockSpec((IN_FEATURES, block), lambda i: (0, i)),
            pl.BlockSpec((HIDDEN, IN_FEATURES), lambda i: (0, 0)),
            pl.BlockSpec((HIDDEN, 1), lambda i: (0, 0)),
            pl.BlockSpec((HIDDEN, HIDDEN), lambda i: (0, 0)),
            pl.BlockSpec((HIDDEN, 1), lambda i: (0, 0)),
            pl.BlockSpec((NY, HIDDEN), lambda i: (0, 0)),
            pl.BlockSpec((NY, 1), lambda i: (0, 0)),
        ],
        out_specs=pl.BlockSpec((NY, block), lambda i: (0, i)),
        compiler_params=pltpu.CompilerParams(
            dimension_semantics=("parallel",)),      # v7x: blocks shard across TCs
        cost_estimate=cost,
    )(xt_lane, w_in, b_in, w_ih, b_cell, w_out, b_out)

    y = jnp.transpose(y_lane[:, :rows].reshape(NY, tv, n_basin), (1, 2, 0))
    head = x[:MAX_DELAY, :, NX - NY:]        # out[t] = x[t, :, -ny:] for t < max_delay
    return jnp.concatenate([head, y], axis=0)  # (nt, n_basin, NY)


def nested_narx_forward(x, params):
    """NestedNarx.forward: each basin gets its own column of x (set_x_data /
    set_y_data), the shared Narx is run per basin, and per-basin outputs are
    concatenated along the basin dim in tree-traversal order. In open loop the
    per-basin runs are independent, so we batch them in one Pallas call and
    permute columns to the traversal order."""
    # TODO(synk): upstream routing (node_us.refresh_y_output / get_y_us_data /
    # set_output) relies on Basin/Node classes not included in the reference.
    out = narx_forward(x, params)
    perm = jnp.array(traversal_output_order(BASIN_TREES), dtype=jnp.int32)
    return out[:, perm, :]


# ---------------------------------------------------------------------------
# Plain-JAX references for validation
# ---------------------------------------------------------------------------
def _reference_core(xt, params, bf16):
    if bf16:
        xt = xt.astype(jnp.bfloat16)
        w_in = params["w_in"].astype(jnp.bfloat16)
        w_ih = params["w_ih"].astype(jnp.bfloat16)
        w_out = params["w_out"].astype(jnp.bfloat16)
    else:
        w_in, w_ih, w_out = params["w_in"], params["w_ih"], params["w_out"]

    h = jnp.einsum("tbf,hf->tbh", xt, w_in, preferred_element_type=jnp.float32)
    h = jnp.maximum(h + params["b_in"], 0.0)
    if bf16:
        h = h.astype(jnp.bfloat16)
    for _ in range(NUM_LAYERS):
        z = jnp.einsum("tbh,gh->tbg", h, w_ih,
                       preferred_element_type=jnp.float32) + params["b_cell"]
        if bf16 and TANH_BF16:
            h = jnp.tanh(z.astype(jnp.bfloat16))
        elif bf16:
            h = jnp.tanh(z).astype(jnp.bfloat16)
        else:
            h = jnp.tanh(z)
    return jnp.einsum("tbh,oh->tbo", h, w_out,
                      preferred_element_type=jnp.float32) + params["b_out"]


def nested_narx_reference(x, params, bf16=False):
    xt = build_narx_inputs_ref(x)
    y = _reference_core(xt, params, bf16)
    head = x[:MAX_DELAY, :, NX - NY:]
    out = jnp.concatenate([head, y], axis=0)
    perm = jnp.array(traversal_output_order(BASIN_TREES), dtype=jnp.int32)
    return out[:, perm, :]


if __name__ == "__main__":
    key = jax.random.PRNGKey(0)
    kx, kp = jax.random.split(key)
    x = jax.random.normal(kx, (NT, N_BASIN, NX), dtype=jnp.float32)
    params = init_params(kp)

    out = jax.block_until_ready(nested_narx_forward(x, params))
    assert out.shape == (NT, N_BASIN, NY), out.shape

    # 1) numerics-matched reference (same bf16 cast points): structural check of
    #    the feature-major slab, blocking, and the traversal permutation.
    ref_matched = nested_narx_reference(x, params, bf16=True)
    np.testing.assert_allclose(np.asarray(out), np.asarray(ref_matched),
                               rtol=5e-2, atol=5e-2)

    # 2) pure-f32 reference (original torch semantics): bf16 drift bound.
    ref_f32 = nested_narx_reference(x, params, bf16=False)
    np.testing.assert_allclose(np.asarray(out), np.asarray(ref_f32),
                               rtol=1.5e-1, atol=1.5e-1)

    print("KERNEL_OK")
</pallas_src>

<mosaic_0001>
module attributes {stable_mosaic.version = 11 : i64} {
  func.func @_narx_mlp_kernel(%arg0: i32, %arg1: memref<10x512xbf16, #tpu.memory_space<vmem>>, %arg2: memref<32x10xbf16, #tpu.memory_space<vmem>>, %arg3: memref<32x1xf32, #tpu.memory_space<vmem>>, %arg4: memref<32x32xbf16, #tpu.memory_space<vmem>>, %arg5: memref<32x1xf32, #tpu.memory_space<vmem>>, %arg6: memref<1x32xbf16, #tpu.memory_space<vmem>>, %arg7: memref<1x1xf32, #tpu.memory_space<vmem>>, %arg8: memref<1x512xf32, #tpu.memory_space<vmem>>) attributes {dimension_semantics = [#tpu.dimension_semantics<parallel>], iteration_bounds = array<i64: 2>, scalar_prefetch = 0 : i64, scratch_operands = 0 : i64, tpu.core_type = #tpu.core_type<tc>, window_params = [{transform_indices = @transform_0, window_bounds = array<i64: 10, 512>}, {pipeline_mode = #tpu.pipeline_mode<synchronous>, transform_indices = @transform_1, window_bounds = array<i64: 32, 10>}, {pipeline_mode = #tpu.pipeline_mode<synchronous>, transform_indices = @transform_2, window_bounds = array<i64: 32, 1>}, {pipeline_mode = #tpu.pipeline_mode<synchronous>, transform_indices = @transform_3, window_bounds = array<i64: 32, 32>}, {pipeline_mode = #tpu.pipeline_mode<synchronous>, transform_indices = @transform_4, window_bounds = array<i64: 32, 1>}, {pipeline_mode = #tpu.pipeline_mode<synchronous>, transform_indices = @transform_5, window_bounds = array<i64: 1, 32>}, {pipeline_mode = #tpu.pipeline_mode<synchronous>, transform_indices = @transform_6, window_bounds = array<i64: 1, 1>}, {transform_indices = @transform_7, window_bounds = array<i64: 1, 512>}]} {
    %c0 = arith.constant 0 : index
    %c0_0 = arith.constant 0 : index
    %0 = vector.load %arg2[%c0, %c0_0] : memref<32x10xbf16, #tpu.memory_space<vmem>>, vector<32x10xbf16>
    %c0_1 = arith.constant 0 : index
    %c0_2 = arith.constant 0 : index
    %1 = vector.load %arg1[%c0_1, %c0_2] : memref<10x512xbf16, #tpu.memory_space<vmem>>, vector<10x512xbf16>
    %cst = arith.constant dense<0.000000e+00> : vector<32x512xf32>
    %2 = tpu.matmul %0, %1, %cst {dimension_numbers = #tpu.dot_dimension_numbers<[1], [0], [0], [1], [0, 0, 1, 1], [], []>} : vector<32x10xbf16>, vector<10x512xbf16>, vector<32x512xf32> -> vector<32x512xf32>
    %c0_3 = arith.constant 0 : index
    %c0_4 = arith.constant 0 : index
    %3 = vector.load %arg3[%c0_3, %c0_4] : memref<32x1xf32, #tpu.memory_space<vmem>>, vector<32x1xf32>
    %4 = vector.broadcast %3 : vector<32x1xf32> to vector<32x512xf32>
    %5 = arith.addf %2, %4 : vector<32x512xf32>
    %cst_5 = arith.constant 0.000000e+00 : f32
    %6 = vector.broadcast %cst_5 : f32 to vector<32x512xf32>
    %7 = arith.maximumf %5, %6 : vector<32x512xf32>
    %8 = arith.truncf %7 : vector<32x512xf32> to vector<32x512xbf16>
    %c0_6 = arith.constant 0 : index
    %c0_7 = arith.constant 0 : index
    %9 = vector.load %arg4[%c0_6, %c0_7] : memref<32x32xbf16, #tpu.memory_space<vmem>>, vector<32x32xbf16>
    %c0_8 = arith.constant 0 : index
    %c0_9 = arith.constant 0 : index
    %10 = vector.load %arg5[%c0_8, %c0_9] : memref<32x1xf32, #tpu.memory_space<vmem>>, vector<32x1xf32>
    %cst_10 = arith.constant dense<0.000000e+00> : vector<32x512xf32>
    %11 = tpu.matmul %9, %8, %cst_10 {dimension_numbers = #tpu.dot_dimension_numbers<[1], [0], [0], [1], [0, 0, 1, 1], [], []>} : vector<32x32xbf16>, vector<32x512xbf16>, vector<32x512xf32> -> vector<32x512xf32>
    %12 = vector.broadcast %10 : vector<32x1xf32> to vector<32x512xf32>
    %13 = arith.addf %11, %12 : vector<32x512xf32>
    %14 = arith.truncf %13 : vector<32x512xf32> to vector<32x512xbf16>
    %15 = math.tanh %14 : vector<32x512xbf16>
    %cst_11 = arith.constant dense<0.000000e+00> : vector<32x512xf32>
    %16 = tpu.matmul %9, %15, %cst_11 {dimension_numbers = #tpu.dot_dimension_numbers<[1], [0], [0], [1], [0, 0, 1, 1], [], []>} : vector<32x32xbf16>, vector<32x512xbf16>, vector<32x512xf32> -> vector<32x512xf32>
    %17 = vector.broadcast %10 : vector<32x1xf32> to vector<32x512xf32>
    %18 = arith.addf %16, %17 : vector<32x512xf32>
    %19 = arith.truncf %18 : vector<32x512xf32> to vector<32x512xbf16>
    %20 = math.tanh %19 : vector<32x512xbf16>
    %cst_12 = arith.constant dense<0.000000e+00> : vector<32x512xf32>
    %21 = tpu.matmul %9, %20, %cst_12 {dimension_numbers = #tpu.dot_dimension_numbers<[1], [0], [0], [1], [0, 0, 1, 1], [], []>} : vector<32x32xbf16>, vector<32x512xbf16>, vector<32x512xf32> -> vector<32x512xf32>
    %22 = vector.broadcast %10 : vector<32x1xf32> to vector<32x512xf32>
    %23 = arith.addf %21, %22 : vector<32x512xf32>
    %24 = arith.truncf %23 : vector<32x512xf32> to vector<32x512xbf16>
    %25 = math.tanh %24 : vector<32x512xbf16>
    %cst_13 = arith.constant dense<0.000000e+00> : vector<32x512xf32>
    %26 = tpu.matmul %9, %25, %cst_13 {dimension_numbers = #tpu.dot_dimension_numbers<[1], [0], [0], [1], [0, 0, 1, 1], [], []>} : vector<32x32xbf16>, vector<32x512xbf16>, vector<32x512xf32> -> vector<32x512xf32>
    %27 = vector.broadcast %10 : vector<32x1xf32> to vector<32x512xf32>
    %28 = arith.addf %26, %27 : vector<32x512xf32>
    %29 = arith.truncf %28 : vector<32x512xf32> to vector<32x512xbf16>
    %30 = math.tanh %29 : vector<32x512xbf16>
    %cst_14 = arith.constant dense<0.000000e+00> : vector<32x512xf32>
    %31 = tpu.matmul %9, %30, %cst_14 {dimension_numbers = #tpu.dot_dimension_numbers<[1], [0], [0], [1], [0, 0, 1, 1], [], []>} : vector<32x32xbf16>, vector<32x512xbf16>, vector<32x512xf32> -> vector<32x512xf32>
    %32 = vector.broadcast %10 : vector<32x1xf32> to vector<32x512xf32>
    %33 = arith.addf %31, %32 : vector<32x512xf32>
    %34 = arith.truncf %33 : vector<32x512xf32> to vector<32x512xbf16>
    %35 = math.tanh %34 : vector<32x512xbf16>
    %cst_15 = arith.constant dense<0.000000e+00> : vector<32x512xf32>
    %36 = tpu.matmul %9, %35, %cst_15 {dimension_numbers = #tpu.dot_dimension_numbers<[1], [0], [0], [1], [0, 0, 1, 1], [], []>} : vector<32x32xbf16>, vector<32x512xbf16>, vector<32x512xf32> -> vector<32x512xf32>
    %37 = vector.broadcast %10 : vector<32x1xf32> to vector<32x512xf32>
    %38 = arith.addf %36, %37 : vector<32x512xf32>
    %39 = arith.truncf %38 : vector<32x512xf32> to vector<32x512xbf16>
    %40 = math.tanh %39 : vector<32x512xbf16>
    %cst_16 = arith.constant dense<0.000000e+00> : vector<32x512xf32>
    %41 = tpu.matmul %9, %40, %cst_16 {dimension_numbers = #tpu.dot_dimension_numbers<[1], [0], [0], [1], [0, 0, 1, 1], [], []>} : vector<32x32xbf16>, vector<32x512xbf16>, vector<32x512xf32> -> vector<32x512xf32>
    %42 = vector.broadcast %10 : vector<32x1xf32> to vector<32x512xf32>
    %43 = arith.addf %41, %42 : vector<32x512xf32>
    %44 = arith.truncf %43 : vector<32x512xf32> to vector<32x512xbf16>
    %45 = math.tanh %44 : vector<32x512xbf16>
    %cst_17 = arith.constant dense<0.000000e+00> : vector<32x512xf32>
    %46 = tpu.matmul %9, %45, %cst_17 {dimension_numbers = #tpu.dot_dimension_numbers<[1], [0], [0], [1], [0, 0, 1, 1], [], []>} : vector<32x32xbf16>, vector<32x512xbf16>, vector<32x512xf32> -> vector<32x512xf32>
    %47 = vector.broadcast %10 : vector<32x1xf32> to vector<32x512xf32>
    %48 = arith.addf %46, %47 : vector<32x512xf32>
    %49 = arith.truncf %48 : vector<32x512xf32> to vector<32x512xbf16>
    %50 = math.tanh %49 : vector<32x512xbf16>
    %cst_18 = arith.constant dense<0.000000e+00> : vector<32x512xf32>
    %51 = tpu.matmul %9, %50, %cst_18 {dimension_numbers = #tpu.dot_dimension_numbers<[1], [0], [0], [1], [0, 0, 1, 1], [], []>} : vector<32x32xbf16>, vector<32x512xbf16>, vector<32x512xf32> -> vector<32x512xf32>
    %52 = vector.broadcast %10 : vector<32x1xf32> to vector<32x512xf32>
    %53 = arith.addf %51, %52 : vector<32x512xf32>
    %54 = arith.truncf %53 : vector<32x512xf32> to vector<32x512xbf16>
    %55 = math.tanh %54 : vector<32x512xbf16>
    %cst_19 = arith.constant dense<0.000000e+00> : vector<32x512xf32>
    %56 = tpu.matmul %9, %55, %cst_19 {dimension_numbers = #tpu.dot_dimension_numbers<[1], [0], [0], [1], [0, 0, 1, 1], [], []>} : vector<32x32xbf16>, vector<32x512xbf16>, vector<32x512xf32> -> vector<32x512xf32>
    %57 = vector.broadcast %10 : vector<32x1xf32> to vector<32x512xf32>
    %58 = arith.addf %56, %57 : vector<32x512xf32>
    %59 = arith.truncf %58 : vector<32x512xf32> to vector<32x512xbf16>
    %60 = math.tanh %59 : vector<32x512xbf16>
    %c0_20 = arith.constant 0 : index
    %c0_21 = arith.constant 0 : index
    %61 = vector.load %arg6[%c0_20, %c0_21] : memref<1x32xbf16, #tpu.memory_space<vmem>>, vector<1x32xbf16>
    %cst_22 = arith.constant dense<0.000000e+00> : vector<1x512xf32>
    %62 = tpu.matmul %61, %60, %cst_22 {dimension_numbers = #tpu.dot_dimension_numbers<[1], [0], [0], [1], [0, 0, 1, 1], [], []>} : vector<1x32xbf16>, vector<32x512xbf16>, vector<1x512xf32> -> vector<1x512xf32>
    %c0_23 = arith.constant 0 : index
    %c0_24 = arith.constant 0 : index
    %63 = vector.load %arg7[%c0_23, %c0_24] : memref<1x1xf32, #tpu.memory_space<vmem>>, vector<1x1xf32>
    %64 = vector.broadcast %63 : vector<1x1xf32> to vector<1x512xf32>
    %65 = arith.addf %62, %64 : vector<1x512xf32>
    %c0_25 = arith.constant 0 : index
    %c0_26 = arith.constant 0 : index
    %66 = vector.load %arg8[%c0_25, %c0_26] : memref<1x512xf32, #tpu.memory_space<vmem>>, vector<1x512xf32>
    tpu.vector_store %arg8[%c0_25, %c0_26], %65 {strides = array<i32>} : memref<1x512xf32, #tpu.memory_space<vmem>>, vector<1x512xf32>,
    return
  }
  func.func @transform_0(%arg0: i32) -> (i32, i32) {
    %c0_i32 = arith.constant 0 : i32
    %c0_i32_0 = arith.constant 0 : i32
    return %c0_i32, %arg0 : i32, i32
  }
  func.func @transform_1(%arg0: i32) -> (i32, i32) {
    %c0_i32 = arith.constant 0 : i32
    %c0_i32_0 = arith.constant 0 : i32
    %c0_i32_1 = arith.constant 0 : i32
    return %c0_i32, %c0_i32_0 : i32, i32
  }
  func.func @transform_2(%arg0: i32) -> (i32, i32) {
    %c0_i32 = arith.constant 0 : i32
    %c0_i32_0 = arith.constant 0 : i32
    %c0_i32_1 = arith.constant 0 : i32
    return %c0_i32, %c0_i32_0 : i32, i32
  }
  func.func @transform_3(%arg0: i32) -> (i32, i32) {
    %c0_i32 = arith.constant 0 : i32
    %c0_i32_0 = arith.constant 0 : i32
    %c0_i32_1 = arith.constant 0 : i32
    return %c0_i32, %c0_i32_0 : i32, i32
  }
  func.func @transform_4(%arg0: i32) -> (i32, i32) {
    %c0_i32 = arith.constant 0 : i32
    %c0_i32_0 = arith.constant 0 : i32
    %c0_i32_1 = arith.constant 0 : i32
    return %c0_i32, %c0_i32_0 : i32, i32
  }
  func.func @transform_5(%arg0: i32) -> (i32, i32) {
    %c0_i32 = arith.constant 0 : i32
    %c0_i32_0 = arith.constant 0 : i32
    %c0_i32_1 = arith.constant 0 : i32
    return %c0_i32, %c0_i32_0 : i32, i32
  }
  func.func @transform_6(%arg0: i32) -> (i32, i32) {
    %c0_i32 = arith.constant 0 : i32
    %c0_i32_0 = arith.constant 0 : i32
    %c0_i32_1 = arith.constant 0 : i32
    return %c0_i32, %c0_i32_0 : i32, i32
  }
  func.func @transform_7(%arg0: i32) -> (i32, i32) {
    %c0_i32 = arith.constant 0 : i32
    %c0_i32_0 = arith.constant 0 : i32
    return %c0_i32, %arg0 : i32, i32
  }
}

</mosaic_0001>

<bundles_post_ra>
// kernel: tpu_custom_call.1
= control target key start
LH: loop header
LB: loop body
LE: loop exit
PB: predicated region body
PF: predicated region fallthrough
CT: control target
= control target key end

     0   :  { %s2853_s0 = inlined_call_operand.vmem [shape: bf16[10,1024], index: 0, kind: input, shape index: {}]   ;;  %s2854_s1 = inlined_call_operand.vmem [shape: bf16[32,10], index: 1, kind: input, shape index: {}]   ;;  %s2855_s2 = inlined_call_operand.vmem [shape: f32[32,1], index: 2, kind: input, shape index: {}]   ;;  %s2856_s3 = inlined_call_operand.vmem [shape: bf16[32,32], index: 3, kind: input, shape index: {}]   ;;  %s2857_s4 = inlined_call_operand.vmem [shape: f32[32,1], index: 4, kind: input, shape index: {}]   ;;  %s2858_s5 = inlined_call_operand.vmem [shape: bf16[1,32], index: 5, kind: input, shape index: {}]   ;;  %s2859_s6 = inlined_call_operand.<no memory space> [shape: f32[1,1], index: 6, kind: input, shape index: {}]   ;;  %s2860_s7 = inlined_call_operand.hbm [shape: f32[1,1024], index: 7, kind: output, shape index: {}]  }
   0x1   :  { %v12_v0 = vstv %s2859_s6 }
   0x2   :  { %13 = vst [vmem:[#allocation2] sm:$0x1] %v12_v0 }
   0x3   :  { %14 = vsyncpa [#allocation5], 0 }
   0x4   :  { %16 = vsyncpa [#allocation5 + $0x1], 0  ;;  %s2388_s26 = smov 0   ;;  %s2390_s27 = smov 0  }
   0x5   :  { %s2392_s28 = smov 0   ;;  %s2394_s29 = smov 0  }
   0x6 LB: > { %s1990_s6 = sadd.s32 4294967295, %s2340_s29   ;;  %s1991_s30 = sadd.s32 4294967294, %s2340_s29   ;;  %s2340_s29 = sphi %s2394_s29, %s2866_s29   ;;  %s2336_s28 = sphi %s2392_s28, %s2865_s28   ;;  %s2332_s27 = sphi %s2390_s27, %s2864_s27   ;;  %s2328_s26 = sphi %s2388_s26, %s2863_s26  }
   0x7   : > { %s2411_s8 = sadd.s32 1, %s2340_s29   ;;  %s29_s9 = sadd.s32 1, %s2336_s28 }
   0x8   : > { %s26_s10 = ssub.s32 %s2340_s29, %s2411_s8  ;;  %p36_p0 = scmp.ne.s32.totalorder %s2336_s28, %s2332_s27 }
   0x9   : > { %p27_p1 = scmp.eq.s32.totalorder %s26_s10, 0  ;;  %p37_p2 = scmp.eq.s32.totalorder %s2340_s29, 0 }
   0xa   : > { %p192_p3 = scmp.eq.s32.totalorder %s1990_s6, 1  ;;  %p197_p4 = scmp.ne.s32.totalorder %s2332_s27, %s2328_s26 }
   0xb   : > { %s2424_s11 = scalar_select %p27_p1, %s2336_s28, %s29_s9  }
   0xc   : > { %p38_p5 = por %p37_p2, %p36_p0  ;;  %p2426_p6 = por %p192_p3, %p36_p0 }
   0xd   : > { %p198_p7 = scmp.eq.s32.totalorder %s1991_s30, 1  ;;  %p1993_p9 = scmp.ge.s32.totalorder %s2340_s29, 2 }
   0xf   : > { %p2430_p8 = por %p198_p7, %p197_p4  ;;  %232 = sbr.rel (%p1993_p9) target bundleno = 29 (0x1d), region = 40 }
  0x16   : > { %235 = sbr.rel (!%p38_p5) target bundleno = 29 (0x1d), region = 44  ;;  %s237_s14 = sand.u32 (%p38_p5), 1, %s2336_s28  }
  0x17   : > { %s2061_s15 = sshll.u32 (%p38_p5), %s2340_s29, 4  ;;  %s1994_s16 = sshll.u32 (%p38_p5), %s237_s14, 5 }
  0x18   : > { %s242_s19 = scalar_lea.vmem (%p38_p5), %s2853_s0, %s2061_s15  ;;  %s239_s20 = scalar_lea.vmem (%p38_p5), [#allocation3], %s1994_s16 }
  0x19   : > { %v255_v1 = vld [vmem:[%s242_s19] sm:$0xff] (%p38_p5)  ;;  %v257_v2 = vld [vmem:[%s242_s19 + $0x8] sm:$0xff] (%p38_p5) }
  0x1a   : > { %v259_v3 = vld [vmem:[%s242_s19 + $0x20] sm:$0xff] (%p38_p5)  ;;  %256 = vst [vmem:[%s239_s20] sm:$0xff] (%p38_p5), %v255_v1  ;;  %258 = vst [vmem:[%s239_s20 + $0x8] sm:$0xff] (%p38_p5), %v257_v2  ;;  %v261_v4 = vld [vmem:[%s242_s19 + $0x28] sm:$0xff] (%p38_p5) }
  0x1b   : > { %260 = vst [vmem:[%s239_s20 + $0x10] sm:$0xff] (%p38_p5), %v259_v3  ;;  %262 = vst [vmem:[%s239_s20 + $0x18] sm:$0xff] (%p38_p5), %v261_v4 }
  0x1d PF: > { %p1997_p10 = scmp.ge.s32.totalorder %s2340_s29, 1  ;;  %p267_p11 = scmp.lt.s32.totalorder %s2340_s29, 3 }
  0x1f   : > { %p268_p12 = pnand %p1997_p10, %p267_p11 }
  0x20   : > { %s2445_s21 = sand.u32 (!%p268_p12), 1, %s2332_s27   ;;  %v2342_v5 = vmov (!%p268_p12), 0   ;;  %vm373_vm0 = vcmask (!%p268_p12), 1044480   ;;  %v316_v6 = vld [vmem:[%s2855_s2] sm:$0xff] (!%p268_p12)  ;;  %v317_v11 = vld [vmem:[%s2855_s2 + $0x8] sm:$0xff] (!%p268_p12)  ;;  %v318_v12 = vld [vmem:[%s2855_s2 + $0x10] sm:$0xff] (!%p268_p12) }
  0x21   : > { %271 = sbr.rel (%p268_p12) target bundleno = 2942 (0xb7e), region = 67  ;;  %s1998_s22 = sshll.u32 (!%p268_p12), %s2445_s21, 5  ;;  %418 = vmatprep.mubr.bf16.mxu0 (!%p268_p12), %v2342_v5  ;;  %471 = vmatprep.mubr.bf16.mxu1 (!%p268_p12), %v2342_v5  ;;  %v2112_v15 = vld [vmem:[%s2854_s1] sm:$0xff] (!%p268_p12)   ;;  %vm366_vm1 = vcmask (!%p268_p12), 80896   ;;  %v319_v17 = vld [vmem:[%s2855_s2 + $0x18] sm:$0xff] (!%p268_p12)  ;;  %v522_v18 = vld [vmem:[%s2857_s4 + $0x10] sm:$0xff] (!%p268_p12) }
  0x22   : > { %2104 = vset.pattern.permute.xlu0 (!%p268_p12), %v2342_v5  ;;  %2105 = vset.pattern.permute.xlu1 (!%p268_p12), %v2342_v5  ;;  %s276_s25 = scalar_lea.vmem (!%p268_p12), [#allocation3], %s1998_s22  ;;  %v520_v16 = vld [vmem:[%s2857_s4] sm:$0xff] (!%p268_p12)  ;;  %v521_v19 = vld [vmem:[%s2857_s4 + $0x8] sm:$0xff] (!%p268_p12)  ;;  %v523_v22 = vld [vmem:[%s2857_s4 + $0x18] sm:$0xff] (!%p268_p12)  ;;  %vm554_vm2 = vcmask (!%p268_p12), 261120   ;;  %s1999_s30 = sshll.u32 (!%p268_p12), %s2445_s21, 2 }
  0x23   : > { %v2106_v7 = vld [vmem:[%s276_s25 + $0x4] ss:$16 sps:$4 sm:$0x1f] (!%p268_p12)   ;;  %322 = vperm.xlu0 (!%p268_p12), %2104, %v316_v6   ;;  %v2108_v8 = vld [vmem:[%s276_s25 + $0xc] ss:$16 sps:$4 sm:$0x1f] (!%p268_p12)   ;;  %332 = vperm.xlu1 (!%p268_p12), %2105, %v318_v12  }
  0x24   : > { %2006 = vmatprep.subr.msk.bf16.mxu0 (!%p268_p12), %vm373_vm0, %v2106_v7  ;;  %v2110_v9 = vld [vmem:[%s276_s25] ss:$16 sps:$4 sm:$0x1f] (!%p268_p12)   ;;  %v2111_v10 = vld [vmem:[%s276_s25 + $0x8] ss:$16 sps:$4 sm:$0x1f] (!%p268_p12)   ;;  %2009 = vmatprep.subr.msk.bf16.mxu1 (!%p268_p12), %vm373_vm0, %v2108_v8 }
  0x25   : > { %v375_v13 = vsel (!%p268_p12), %vm373_vm0, %v2110_v9, 0  ;;  %v381_v14 = vsel (!%p268_p12), %vm373_vm0, %v2111_v10, 0  ;;  %v2113_v20 = vld [vmem:[%s2854_s1 + $0x8] sm:$0xff] (!%p268_p12)   ;;  %v1782_v21 = vld [vmem:[#allocation2] sm:$0x1] (!%p268_p12)  ;;  %s2062_s9 = sshll.u32 (!%p268_p12), %s1990_s6, 6 }
  0x26   : > { %387 = vmatpush1.bf16.msra.mxu0 (!%p268_p12), %v375_v13  ;;  %440 = vmatpush1.bf16.msra.mxu1 (!%p268_p12), %v381_v14  ;;  %s304_s10 = scalar_lea.vmem (!%p268_p12), [#allocation4], %s1999_s30  ;;  %s2809_s17 = scalar_lea.hbm (!%p268_p12), %s2860_s7, %s2062_s9 }
  0x27   : > { %327 = vperm.xlu0 (!%p268_p12), %2104, %v317_v11   ;;  %337 = vperm.xlu1 (!%p268_p12), %2105, %v319_v17   ;;  %s1926_s14 = sshll.u32 (!%p268_p12), %s304_s10, 4  ;;  %s1912_s18 = scalar_lea.sflag (!%p268_p12), [#allocation5], %s2445_s21  ;;  %s2811_s14 = int_to_ptr.vmem [resolvable:$true] %s1926_s14 }
  0x28   : > { %s2278_s19 = scalar_lea.vmem %s2811_s14, 64  ;;  %s2344_s6 = smov [#allocation4]  }
  0x29   : > { %2007 = vmatmul.mubr.msk.bf16.vlgmr.msra.gmra.mrb[0].mxu0 %vm366_vm1, %v2112_v15  ;;  %2010 = vmatmul.mubr.msk.bf16.vlgmr.msra.gmra.mrb[0].mxu1 %vm366_vm1, %v2112_v15  ;;  %p2279_p13 = scmp.ne.s32.totalorder %s2811_s14, %s2278_s19  ;;  %s2282_s20 = sshll.u32 %s2344_s6, 4  ;;  %s2283_s20 = int_to_ptr.vmem [resolvable:$false] %s2282_s20 }
  0x2a   : > { %428 = vmatprep.mubr.bf16.mxu0 %v2342_v5  ;;  %481 = vmatprep.mubr.bf16.mxu1 %v2342_v5  ;;  %s2284_s22 = scalar_lea.vmem %s2283_s20, 128  ;;  %p2285_p2 = scmp.lt.s32.totalorder %s2811_s14, %s2283_s20 }
  0x2b   : > { %526 = vperm.xlu0 %2104, %v520_v16   ;;  %531 = vperm.xlu1 %2105, %v521_v19   ;;  %p2280_p0 = pnand %p2279_p13, %p2426_p6  ;;  %p2286_p3 = scmp.lt.s32.totalorder %s2284_s22, %s2278_s19 }
  0x2d   : > { %p2281_p1 = pneg %p2280_p0  ;;  %p2287_p4 = por %p2286_p3, %p2285_p2 }
  0x2f   : > { %536 = vperm.xlu0 %2104, %v522_v18   ;;  %541 = vperm.xlu1 %2105, %v523_v22   ;;  %p2288_p5 = pnand %p2287_p4, %p2281_p1 }
  0x31   : > { %2008 = vmatmul.mubr.msk.bf16.gmra.mrb[4].mxu0 %vm366_vm1, %v2113_v20  ;;  %2011 = vmatmul.mubr.msk.bf16.gmra.mrb[4].mxu1 %vm366_vm1, %v2113_v20  ;;  %v2493_v20 = vld [vmem:[%s2856_s3] sm:$0xff]  }
  0x32   : > { %593 = vmatprep.mubr.bf16.mxu0 %v2342_v5  ;;  %646 = vmatprep.mubr.bf16.mxu1 %v2342_v5 }
  0x33   : > { %1785 = vperm.xlu0 %2104, %v1782_v21   ;;  %v2504_v21 = vld [vmem:[%s2856_s3 + $0x8] sm:$0xff]  }
  0xa2   : > { %v323_v23 = vpop.permute.xlu0 %322  ;;  %v333_v25 = vpop.permute.xlu1 %332 }
  0xa6   : > { %v328_v24 = vpop.permute.xlu0 %327  ;;  %v338_v50 = vpop.permute.xlu1 %337 }
  0xaa   : > { %v2512_v22 = vpop.permute.xlu0 %526 }
  0xfc   : > { %v420_v26 = vpop.f32.mrb[0].mxu0  ;;  %v473_v27 = vpop.f32.mrb[0].mxu1 }
  0xfd   : > { %v421_v28 = vadd.f32 %v420_v26, %v323_v23  ;;  %v474_v29 = vadd.f32 %v473_v27, %v323_v23  ;;  %v422_v30 = vpop.f32.mrb[1].mxu0  ;;  %v475_v31 = vpop.f32.mrb[1].mxu1 }
  0xfe   : > { %v423_v32 = vadd.f32 %v422_v30, %v323_v23  ;;  %v476_v33 = vadd.f32 %v475_v31, %v323_v23  ;;  %v424_v34 = vpop.f32.mrb[2].mxu0  ;;  %v477_v35 = vpop.f32.mrb[2].mxu1 }
  0xff   : > { %v425_v36 = vadd.f32 %v424_v34, %v328_v24  ;;  %v478_v37 = vadd.f32 %v477_v35, %v328_v24  ;;  %v426_v38 = vpop.f32.mrb[3].mxu0  ;;  %v479_v39 = vpop.f32.mrb[3].mxu1  ;;  %v492_v42 = vmax.f32 %v421_v28, 0.0  ;;  %v494_v43 = vmax.f32 %v474_v29, 0.0 }
 0x100   : > { %v427_v40 = vadd.f32 %v426_v38, %v328_v24  ;;  %v480_v41 = vadd.f32 %v479_v39, %v328_v24  ;;  %v493_v46 = vmax.f32 %v423_v32, 0.0  ;;  %v495_v47 = vmax.f32 %v476_v33, 0.0  ;;  %v2514_v23 = vpop.permute.xlu1 %531 }
 0x101   : > { %v496_v44 = vmax.f32 %v425_v36, 0.0  ;;  %v498_v45 = vmax.f32 %v478_v37, 0.0 }
 0x102   : > { %v497_v48 = vmax.f32 %v427_v40, 0.0  ;;  %v499_v49 = vmax.f32 %v480_v41, 0.0 }
 0x103   : > { %v508_v51 = vpack.c.bf16 %v496_v44, %v492_v42  ;;  %v510_v52 = vpack.c.bf16 %v498_v45, %v494_v43  ;;  %v2524_v44 = vpop.permute.xlu0 %536 }
 0x104   : > { %v509_v53 = vpack.c.bf16 %v497_v48, %v493_v46  ;;  %v511_v54 = vpack.c.bf16 %v499_v49, %v495_v47  ;;  %v430_v55 = vpop.f32.mrb[4].mxu0  ;;  %v483_v56 = vpop.f32.mrb[4].mxu1 }
 0x105   : > { %v431_v57 = vadd.f32 %v430_v55, %v333_v25  ;;  %v484_v58 = vadd.f32 %v483_v56, %v333_v25  ;;  %v432_v59 = vpop.f32.mrb[5].mxu0  ;;  %v485_v60 = vpop.f32.mrb[5].mxu1 }
 0x106   : > { %v433_v61 = vadd.f32 %v432_v59, %v333_v25  ;;  %v486_v62 = vadd.f32 %v485_v60, %v333_v25  ;;  %v434_v63 = vpop.f32.mrb[6].mxu0  ;;  %v487_v0 = vpop.f32.mrb[6].mxu1  ;;  %561 = vmatprep.subr.bf16.mxu0 %v509_v53  ;;  %614 = vmatprep.subr.bf16.mxu1 %v511_v54 }
 0x107   : > { %v435_v1 = vadd.f32 %v434_v63, %v338_v50  ;;  %v488_v2 = vadd.f32 %v487_v0, %v338_v50  ;;  %v436_v3 = vpop.f32.mrb[7].mxu0  ;;  %v489_v4 = vpop.f32.mrb[7].mxu1  ;;  %562 = vmatpush1.bf16.msra.mxu0 %v508_v51  ;;  %615 = vmatpush1.bf16.msra.mxu1 %v510_v52  ;;  %v500_v8 = vmax.f32 %v431_v57, 0.0  ;;  %v502_v9 = vmax.f32 %v484_v58, 0.0 }
 0x108   : > { %v437_v6 = vadd.f32 %v436_v3, %v338_v50  ;;  %v490_v7 = vadd.f32 %v489_v4, %v338_v50  ;;  %v501_v12 = vmax.f32 %v433_v61, 0.0  ;;  %v503_v13 = vmax.f32 %v486_v62, 0.0  ;;  %v2526_v45 = vpop.permute.xlu1 %541 }
 0x109   : > { %v504_v10 = vmax.f32 %v435_v1, 0.0  ;;  %v506_v11 = vmax.f32 %v488_v2, 0.0 }
 0x10a   : > { %v505_v14 = vmax.f32 %v437_v6, 0.0  ;;  %v507_v15 = vmax.f32 %v490_v7, 0.0 }
 0x10b   : > { %v512_v16 = vpack.c.bf16 %v504_v10, %v500_v8  ;;  %v514_v17 = vpack.c.bf16 %v506_v11, %v502_v9 }
 0x10c   : > { %v513_v18 = vpack.c.bf16 %v505_v14, %v501_v12  ;;  %v515_v19 = vpack.c.bf16 %v507_v15, %v503_v13 }
 0x10e   : > { %563 = vmatprep.subr.bf16.mxu0 %v513_v18  ;;  %616 = vmatprep.subr.bf16.mxu1 %v515_v19 }
 0x10f   : > { %564 = vmatpush1.bf16.msra.mxu0 %v512_v16  ;;  %617 = vmatpush1.bf16.msra.mxu1 %v514_v17 }
 0x112   : > { %2014 = vmatmul.mubr.msk.bf16.vlgmr.msra.gmra.mrb[8].mxu0 %vm554_vm2, %v2493_v20  ;;  %2016 = vmatmul.mubr.msk.bf16.vlgmr.msra.gmra.mrb[8].mxu1 %vm554_vm2, %v2493_v20 }
 0x113   : > { %603 = vmatprep.mubr.bf16.mxu0 %v2342_v5  ;;  %656 = vmatprep.mubr.bf16.mxu1 %v2342_v5 }
 0x11a   : > { %2015 = vmatmul.mubr.msk.bf16.gmra.mrb[12].mxu0 %vm554_vm2, %v2504_v21  ;;  %2017 = vmatmul.mubr.msk.bf16.gmra.mrb[12].mxu1 %vm554_vm2, %v2504_v21 }
 0x11b   : > { %715 = vmatprep.mubr.bf16.mxu0 %v2342_v5  ;;  %768 = vmatprep.mubr.bf16.mxu1 %v2342_v5 }
 0x1e5   : > { %v595_v24 = vpop.f32.mrb[8].mxu0  ;;  %v648_v25 = vpop.f32.mrb[8].mxu1 }
 0x1e6   : > { %v597_v26 = vpop.f32.mrb[9].mxu0  ;;  %v650_v27 = vpop.f32.mrb[9].mxu1  ;;  %v596_v30 = vadd.f32 %v595_v24, %v2512_v22  ;;  %v649_v31 = vadd.f32 %v648_v25, %v2512_v22 }
 0x1e7   : > { %v599_v28 = vpop.f32.mrb[10].mxu0  ;;  %v652_v29 = vpop.f32.mrb[10].mxu1  ;;  %v598_v36 = vadd.f32 %v597_v26, %v2512_v22  ;;  %v651_v37 = vadd.f32 %v650_v27, %v2512_v22 }
 0x1e8   : > { %v600_v32 = vadd.f32 %v599_v28, %v2514_v23  ;;  %v653_v33 = vadd.f32 %v652_v29, %v2514_v23  ;;  %v601_v34 = vpop.f32.mrb[11].mxu0  ;;  %v654_v35 = vpop.f32.mrb[11].mxu1 }
 0x1e9   : > { %v602_v38 = vadd.f32 %v601_v34, %v2514_v23  ;;  %v655_v39 = vadd.f32 %v654_v35, %v2514_v23 }
 0x1ea   : > { %v667_v40 = vpack.c.bf16 %v600_v32, %v596_v30  ;;  %v669_v41 = vpack.c.bf16 %v653_v33, %v649_v31 }
 0x1eb   : > { %v668_v42 = vpack.c.bf16 %v602_v38, %v598_v36  ;;  %v670_v43 = vpack.c.bf16 %v655_v39, %v651_v37 }
 0x1ec   : > { %2116 = vtanh.bf16 %v667_v40 }
 0x1ed   : > { %2118 = vtanh.bf16 %v669_v41  ;;  %v605_v46 = vpop.f32.mrb[12].mxu0  ;;  %v658_v47 = vpop.f32.mrb[12].mxu1 }
 0x1ee   : > { %2120 = vtanh.bf16 %v668_v42  ;;  %v607_v48 = vpop.f32.mrb[13].mxu0  ;;  %v660_v49 = vpop.f32.mrb[13].mxu1  ;;  %v606_v52 = vadd.f32 %v605_v46, %v2524_v44  ;;  %v659_v53 = vadd.f32 %v658_v47, %v2524_v44 }
 0x1ef   : > { %2122 = vtanh.bf16 %v670_v43  ;;  %v609_v50 = vpop.f32.mrb[14].mxu0  ;;  %v662_v51 = vpop.f32.mrb[14].mxu1  ;;  %v608_v58 = vadd.f32 %v607_v48, %v2524_v44  ;;  %v661_v59 = vadd.f32 %v660_v49, %v2524_v44 }
 0x1f0   : > { %v610_v54 = vadd.f32 %v609_v50, %v2526_v45  ;;  %v663_v55 = vadd.f32 %v662_v51, %v2526_v45  ;;  %v611_v56 = vpop.f32.mrb[15].mxu0  ;;  %v664_v57 = vpop.f32.mrb[15].mxu1 }
 0x1f1   : > { %v612_v60 = vadd.f32 %v611_v56, %v2526_v45  ;;  %v665_v61 = vadd.f32 %v664_v57, %v2526_v45 }
 0x1f2   : > { %v671_v62 = vpack.c.bf16 %v610_v54, %v606_v52  ;;  %v673_v63 = vpack.c.bf16 %v663_v55, %v659_v53 }
 0x1f3   : > { %v672_v0 = vpack.c.bf16 %v612_v60, %v608_v58  ;;  %v674_v1 = vpack.c.bf16 %v665_v61, %v661_v59 }
 0x1f4   : > { %2124 = vtanh.bf16 %v671_v62 }
 0x1f5   : > { %2126 = vtanh.bf16 %v672_v0 }
 0x1f6   : > { %2128 = vtanh.bf16 %v674_v1 }
 0x1f7   : > { %v2117_v2 = vpop.eup %2116  ;;  %2130 = vtanh.bf16 %v673_v63 }
 0x1f8   : > { %v2119_v3 = vpop.eup %2118 }
 0x1f9   : > { %v2121_v4 = vpop.eup %2120 }
 0x1fa   : > { %v2123_v6 = vpop.eup %2122  ;;  %683 = vmatprep.subr.bf16.mxu0 %v2121_v4 }
 0x1fb   : > { %736 = vmatprep.subr.bf16.mxu1 %v2123_v6  ;;  %684 = vmatpush1.bf16.msra.mxu0 %v2117_v2 }
 0x1fc   : > { %737 = vmatpush1.bf16.msra.mxu1 %v2119_v3 }
 0x1ff   : > { %v2125_v7 = vpop.eup %2124 }
 0x200   : > { %v2127_v8 = vpop.eup %2126 }
 0x201   : > { %v2129_v9 = vpop.eup %2128  ;;  %685 = vmatprep.subr.bf16.mxu0 %v2127_v8 }
 0x202   : > { %v2131_v10 = vpop.eup %2130  ;;  %738 = vmatprep.subr.bf16.mxu1 %v2129_v9  ;;  %686 = vmatpush1.bf16.msra.mxu0 %v2125_v7 }
 0x203   : > { %739 = vmatpush1.bf16.msra.mxu1 %v2131_v10 }
 0x205   : > { %2018 = vmatmul.mubr.msk.bf16.vlgmr.msra.gmra.mrb[16].mxu0 %vm554_vm2, %v2493_v20 }
 0x206   : > { %2020 = vmatmul.mubr.msk.bf16.vlgmr.msra.gmra.mrb[16].mxu1 %vm554_vm2, %v2493_v20  ;;  %725 = vmatprep.mubr.bf16.mxu0 %v2342_v5 }
 0x207   : > { %778 = vmatprep.mubr.bf16.mxu1 %v2342_v5 }
 0x20d   : > { %2019 = vmatmul.mubr.msk.bf16.gmra.mrb[20].mxu0 %vm554_vm2, %v2504_v21 }
 0x20e   : > { %2021 = vmatmul.mubr.msk.bf16.gmra.mrb[20].mxu1 %vm554_vm2, %v2504_v21  ;;  %837 = vmatprep.mubr.bf16.mxu0 %v2342_v5 }
 0x20f   : > { %890 = vmatprep.mubr.bf16.mxu1 %v2342_v5 }
 0x2d8   : > { %v717_v11 = vpop.f32.mrb[16].mxu0 }
 0x2d9   : > { %v770_v12 = vpop.f32.mrb[16].mxu1  ;;  %v719_v13 = vpop.f32.mrb[17].mxu0  ;;  %v718_v16 = vadd.f32 %v717_v11, %v2512_v22 }
 0x2da   : > { %v772_v14 = vpop.f32.mrb[17].mxu1  ;;  %v721_v15 = vpop.f32.mrb[18].mxu0  ;;  %v771_v24 = vadd.f32 %v770_v12, %v2512_v22  ;;  %v720_v25 = vadd.f32 %v719_v13, %v2512_v22 }
 0x2db   : > { %v722_v17 = vadd.f32 %v721_v15, %v2514_v23  ;;  %v774_v18 = vpop.f32.mrb[18].mxu1  ;;  %v723_v19 = vpop.f32.mrb[19].mxu0  ;;  %v773_v29 = vadd.f32 %v772_v14, %v2512_v22 }
 0x2dc   : > { %v775_v26 = vadd.f32 %v774_v18, %v2514_v23  ;;  %v724_v27 = vadd.f32 %v723_v19, %v2514_v23  ;;  %v776_v28 = vpop.f32.mrb[19].mxu1 }
 0x2dd   : > { %v789_v30 = vpack.c.bf16 %v722_v17, %v718_v16  ;;  %v777_v31 = vadd.f32 %v776_v28, %v2514_v23 }
 0x2de   : > { %v791_v32 = vpack.c.bf16 %v775_v26, %v771_v24  ;;  %v790_v33 = vpack.c.bf16 %v724_v27, %v720_v25 }
 0x2df   : > { %v792_v34 = vpack.c.bf16 %v777_v31, %v773_v29  ;;  %2132 = vtanh.bf16 %v789_v30 }
 0x2e0   : > { %v727_v35 = vpop.f32.mrb[20].mxu0  ;;  %2134 = vtanh.bf16 %v790_v33 }
 0x2e1   : > { %v780_v36 = vpop.f32.mrb[20].mxu1  ;;  %v729_v37 = vpop.f32.mrb[21].mxu0  ;;  %2136 = vtanh.bf16 %v792_v34  ;;  %v728_v40 = vadd.f32 %v727_v35, %v2524_v44 }
 0x2e2   : > { %v782_v38 = vpop.f32.mrb[21].mxu1  ;;  %v731_v39 = vpop.f32.mrb[22].mxu0  ;;  %2138 = vtanh.bf16 %v791_v32  ;;  %v781_v46 = vadd.f32 %v780_v36, %v2524_v44  ;;  %v730_v47 = vadd.f32 %v729_v37, %v2524_v44 }
 0x2e3   : > { %v732_v41 = vadd.f32 %v731_v39, %v2526_v45  ;;  %v784_v42 = vpop.f32.mrb[22].mxu1  ;;  %v733_v43 = vpop.f32.mrb[23].mxu0  ;;  %v783_v51 = vadd.f32 %v782_v38, %v2524_v44 }
 0x2e4   : > { %v785_v48 = vadd.f32 %v784_v42, %v2526_v45  ;;  %v734_v49 = vadd.f32 %v733_v43, %v2526_v45  ;;  %v786_v50 = vpop.f32.mrb[23].mxu1 }
 0x2e5   : > { %v793_v52 = vpack.c.bf16 %v732_v41, %v728_v40  ;;  %v787_v53 = vadd.f32 %v786_v50, %v2526_v45 }
 0x2e6   : > { %v795_v54 = vpack.c.bf16 %v785_v48, %v781_v46  ;;  %v794_v55 = vpack.c.bf16 %v734_v49, %v730_v47 }
 0x2e7   : > { %v796_v56 = vpack.c.bf16 %v787_v53, %v783_v51  ;;  %2140 = vtanh.bf16 %v793_v52 }
 0x2e8   : > { %2142 = vtanh.bf16 %v794_v55 }
 0x2e9   : > { %2144 = vtanh.bf16 %v796_v56 }
 0x2ea   : > { %v2133_v57 = vpop.eup %2132  ;;  %2146 = vtanh.bf16 %v795_v54 }
 0x2eb   : > { %v2135_v58 = vpop.eup %2134 }
 0x2ec   : > { %v2137_v59 = vpop.eup %2136  ;;  %805 = vmatprep.subr.bf16.mxu0 %v2135_v58 }
 0x2ed   : > { %v2139_v60 = vpop.eup %2138  ;;  %858 = vmatprep.subr.bf16.mxu1 %v2137_v59  ;;  %806 = vmatpush1.bf16.msra.mxu0 %v2133_v57 }
 0x2ee   : > { %859 = vmatpush1.bf16.msra.mxu1 %v2139_v60 }
 0x2f2   : > { %v2141_v61 = vpop.eup %2140 }
 0x2f3   : > { %v2143_v62 = vpop.eup %2142 }
 0x2f4   : > { %v2145_v63 = vpop.eup %2144  ;;  %807 = vmatprep.subr.bf16.mxu0 %v2143_v62 }
 0x2f5   : > { %v2147_v0 = vpop.eup %2146  ;;  %860 = vmatprep.subr.bf16.mxu1 %v2145_v63  ;;  %808 = vmatpush1.bf16.msra.mxu0 %v2141_v61 }
 0x2f6   : > { %861 = vmatpush1.bf16.msra.mxu1 %v2147_v0 }
 0x2f8   : > { %2022 = vmatmul.mubr.msk.bf16.vlgmr.msra.gmra.mrb[24].mxu0 %vm554_vm2, %v2493_v20 }
 0x2f9   : > { %2024 = vmatmul.mubr.msk.bf16.vlgmr.msra.gmra.mrb[24].mxu1 %vm554_vm2, %v2493_v20  ;;  %847 = vmatprep.mubr.bf16.mxu0 %v2342_v5 }
 0x2fa   : > { %900 = vmatprep.mubr.bf16.mxu1 %v2342_v5 }
 0x300   : > { %2023 = vmatmul.mubr.msk.bf16.gmra.mrb[28].mxu0 %vm554_vm2, %v2504_v21 }
 0x301   : > { %2025 = vmatmul.mubr.msk.bf16.gmra.mrb[28].mxu1 %vm554_vm2, %v2504_v21  ;;  %959 = vmatprep.mubr.bf16.mxu0 %v2342_v5 }
 0x302   : > { %1012 = vmatprep.mubr.bf16.mxu1 %v2342_v5 }
 0x3cb   : > { %v839_v1 = vpop.f32.mrb[24].mxu0 }
 0x3cc   : > { %v892_v2 = vpop.f32.mrb[24].mxu1  ;;  %v841_v3 = vpop.f32.mrb[25].mxu0  ;;  %v840_v7 = vadd.f32 %v839_v1, %v2512_v22 }
 0x3cd   : > { %v894_v4 = vpop.f32.mrb[25].mxu1  ;;  %v843_v6 = vpop.f32.mrb[26].mxu0  ;;  %v893_v11 = vadd.f32 %v892_v2, %v2512_v22  ;;  %v842_v12 = vadd.f32 %v841_v3, %v2512_v22 }
 0x3ce   : > { %v844_v8 = vadd.f32 %v843_v6, %v2514_v23  ;;  %v896_v9 = vpop.f32.mrb[26].mxu1  ;;  %v845_v10 = vpop.f32.mrb[27].mxu0  ;;  %v895_v16 = vadd.f32 %v894_v4, %v2512_v22 }
 0x3cf   : > { %v897_v13 = vadd.f32 %v896_v9, %v2514_v23  ;;  %v846_v14 = vadd.f32 %v845_v10, %v2514_v23  ;;  %v898_v15 = vpop.f32.mrb[27].mxu1 }
 0x3d0   : > { %v911_v17 = vpack.c.bf16 %v844_v8, %v840_v7  ;;  %v899_v18 = vadd.f32 %v898_v15, %v2514_v23 }
 0x3d1   : > { %v913_v19 = vpack.c.bf16 %v897_v13, %v893_v11  ;;  %v912_v24 = vpack.c.bf16 %v846_v14, %v842_v12 }
 0x3d2   : > { %v914_v25 = vpack.c.bf16 %v899_v18, %v895_v16  ;;  %2148 = vtanh.bf16 %v911_v17 }
 0x3d3   : > { %v849_v26 = vpop.f32.mrb[28].mxu0  ;;  %2150 = vtanh.bf16 %v912_v24 }
 0x3d4   : > { %v902_v27 = vpop.f32.mrb[28].mxu1  ;;  %v851_v28 = vpop.f32.mrb[29].mxu0  ;;  %2152 = vtanh.bf16 %v914_v25  ;;  %v850_v31 = vadd.f32 %v849_v26, %v2524_v44 }
 0x3d5   : > { %v904_v29 = vpop.f32.mrb[29].mxu1  ;;  %v853_v30 = vpop.f32.mrb[30].mxu0  ;;  %2154 = vtanh.bf16 %v913_v19  ;;  %v903_v35 = vadd.f32 %v902_v27, %v2524_v44  ;;  %v852_v36 = vadd.f32 %v851_v28, %v2524_v44 }
 0x3d6   : > { %v854_v32 = vadd.f32 %v853_v30, %v2526_v45  ;;  %v906_v33 = vpop.f32.mrb[30].mxu1  ;;  %v855_v34 = vpop.f32.mrb[31].mxu0  ;;  %v905_v40 = vadd.f32 %v904_v29, %v2524_v44 }
 0x3d7   : > { %v907_v37 = vadd.f32 %v906_v33, %v2526_v45  ;;  %v856_v38 = vadd.f32 %v855_v34, %v2526_v45  ;;  %v908_v39 = vpop.f32.mrb[31].mxu1 }
 0x3d8   : > { %v915_v41 = vpack.c.bf16 %v854_v32, %v850_v31  ;;  %v909_v42 = vadd.f32 %v908_v39, %v2526_v45 }
 0x3d9   : > { %v917_v43 = vpack.c.bf16 %v907_v37, %v903_v35  ;;  %v916_v46 = vpack.c.bf16 %v856_v38, %v852_v36 }
 0x3da   : > { %v918_v47 = vpack.c.bf16 %v909_v42, %v905_v40  ;;  %2156 = vtanh.bf16 %v915_v41 }
 0x3db   : > { %2158 = vtanh.bf16 %v916_v46 }
 0x3dc   : > { %2160 = vtanh.bf16 %v918_v47 }
 0x3dd   : > { %v2149_v48 = vpop.eup %2148  ;;  %2162 = vtanh.bf16 %v917_v43 }
 0x3de   : > { %v2151_v49 = vpop.eup %2150 }
 0x3df   : > { %v2153_v50 = vpop.eup %2152  ;;  %927 = vmatprep.subr.bf16.mxu0 %v2151_v49 }
 0x3e0   : > { %v2155_v51 = vpop.eup %2154  ;;  %980 = vmatprep.subr.bf16.mxu1 %v2153_v50  ;;  %928 = vmatpush1.bf16.msra.mxu0 %v2149_v48 }
 0x3e1   : > { %981 = vmatpush1.bf16.msra.mxu1 %v2155_v51 }
 0x3e5   : > { %v2157_v52 = vpop.eup %2156 }
 0x3e6   : > { %v2159_v53 = vpop.eup %2158 }
 0x3e7   : > { %v2161_v54 = vpop.eup %2160  ;;  %929 = vmatprep.subr.bf16.mxu0 %v2159_v53 }
 0x3e8   : > { %v2163_v55 = vpop.eup %2162  ;;  %982 = vmatprep.subr.bf16.mxu1 %v2161_v54  ;;  %930 = vmatpush1.bf16.msra.mxu0 %v2157_v52 }
 0x3e9   : > { %983 = vmatpush1.bf16.msra.mxu1 %v2163_v55 }
 0x3eb   : > { %2026 = vmatmul.mubr.msk.bf16.vlgmr.msra.gmra.mrb[32].mxu0 %vm554_vm2, %v2493_v20 }
 0x3ec   : > { %2028 = vmatmul.mubr.msk.bf16.vlgmr.msra.gmra.mrb[32].mxu1 %vm554_vm2, %v2493_v20  ;;  %969 = vmatprep.mubr.bf16.mxu0 %v2342_v5 }
 0x3ed   : > { %1022 = vmatprep.mubr.bf16.mxu1 %v2342_v5 }
 0x3f3   : > { %2027 = vmatmul.mubr.msk.bf16.gmra.mrb[36].mxu0 %vm554_vm2, %v2504_v21 }
 0x3f4   : > { %2029 = vmatmul.mubr.msk.bf16.gmra.mrb[36].mxu1 %vm554_vm2, %v2504_v21  ;;  %1081 = vmatprep.mubr.bf16.mxu0 %v2342_v5 }
 0x3f5   : > { %1134 = vmatprep.mubr.bf16.mxu1 %v2342_v5 }
 0x4be   : > { %v961_v56 = vpop.f32.mrb[32].mxu0 }
 0x4bf   : > { %v1014_v57 = vpop.f32.mrb[32].mxu1  ;;  %v963_v58 = vpop.f32.mrb[33].mxu0  ;;  %v962_v61 = vadd.f32 %v961_v56, %v2512_v22 }
 0x4c0   : > { %v1016_v59 = vpop.f32.mrb[33].mxu1  ;;  %v965_v60 = vpop.f32.mrb[34].mxu0  ;;  %v1015_v1 = vadd.f32 %v1014_v57, %v2512_v22  ;;  %v964_v2 = vadd.f32 %v963_v58, %v2512_v22 }
 0x4c1   : > { %v966_v62 = vadd.f32 %v965_v60, %v2514_v23  ;;  %v1018_v63 = vpop.f32.mrb[34].mxu1  ;;  %v967_v0 = vpop.f32.mrb[35].mxu0  ;;  %v1017_v7 = vadd.f32 %v1016_v59, %v2512_v22 }
 0x4c2   : > { %v1019_v3 = vadd.f32 %v1018_v63, %v2514_v23  ;;  %v968_v4 = vadd.f32 %v967_v0, %v2514_v23  ;;  %v1020_v6 = vpop.f32.mrb[35].mxu1 }
 0x4c3   : > { %v1033_v8 = vpack.c.bf16 %v966_v62, %v962_v61  ;;  %v1021_v9 = vadd.f32 %v1020_v6, %v2514_v23 }
 0x4c4   : > { %v1035_v10 = vpack.c.bf16 %v1019_v3, %v1015_v1  ;;  %v1034_v11 = vpack.c.bf16 %v968_v4, %v964_v2 }
 0x4c5   : > { %v1036_v12 = vpack.c.bf16 %v1021_v9, %v1017_v7  ;;  %2164 = vtanh.bf16 %v1033_v8 }
 0x4c6   : > { %v971_v13 = vpop.f32.mrb[36].mxu0  ;;  %2166 = vtanh.bf16 %v1034_v11 }
 0x4c7   : > { %v1024_v14 = vpop.f32.mrb[36].mxu1  ;;  %v973_v15 = vpop.f32.mrb[37].mxu0  ;;  %2168 = vtanh.bf16 %v1036_v12  ;;  %v972_v18 = vadd.f32 %v971_v13, %v2524_v44 }
 0x4c8   : > { %v1026_v16 = vpop.f32.mrb[37].mxu1  ;;  %v975_v17 = vpop.f32.mrb[38].mxu0  ;;  %2170 = vtanh.bf16 %v1035_v10  ;;  %v1025_v26 = vadd.f32 %v1024_v14, %v2524_v44  ;;  %v974_v27 = vadd.f32 %v973_v15, %v2524_v44 }
 0x4c9   : > { %v976_v19 = vadd.f32 %v975_v17, %v2526_v45  ;;  %v1028_v24 = vpop.f32.mrb[38].mxu1  ;;  %v977_v25 = vpop.f32.mrb[39].mxu0  ;;  %v1027_v31 = vadd.f32 %v1026_v16, %v2524_v44 }
 0x4ca   : > { %v1029_v28 = vadd.f32 %v1028_v24, %v2526_v45  ;;  %v978_v29 = vadd.f32 %v977_v25, %v2526_v45  ;;  %v1030_v30 = vpop.f32.mrb[39].mxu1 }
 0x4cb   : > { %v1037_v32 = vpack.c.bf16 %v976_v19, %v972_v18  ;;  %v1031_v33 = vadd.f32 %v1030_v30, %v2526_v45 }
 0x4cc   : > { %v1039_v34 = vpack.c.bf16 %v1029_v28, %v1025_v26  ;;  %v1038_v35 = vpack.c.bf16 %v978_v29, %v974_v27 }
 0x4cd   : > { %v1040_v36 = vpack.c.bf16 %v1031_v33, %v1027_v31  ;;  %2172 = vtanh.bf16 %v1037_v32 }
 0x4ce   : > { %2174 = vtanh.bf16 %v1038_v35 }
 0x4cf   : > { %2176 = vtanh.bf16 %v1040_v36 }
 0x4d0   : > { %v2165_v37 = vpop.eup %2164  ;;  %2178 = vtanh.bf16 %v1039_v34 }
 0x4d1   : > { %v2167_v38 = vpop.eup %2166 }
 0x4d2   : > { %v2169_v39 = vpop.eup %2168  ;;  %1049 = vmatprep.subr.bf16.mxu0 %v2167_v38 }
 0x4d3   : > { %v2171_v40 = vpop.eup %2170  ;;  %1102 = vmatprep.subr.bf16.mxu1 %v2169_v39  ;;  %1050 = vmatpush1.bf16.msra.mxu0 %v2165_v37 }
 0x4d4   : > { %1103 = vmatpush1.bf16.msra.mxu1 %v2171_v40 }
 0x4d8   : > { %v2173_v41 = vpop.eup %2172 }
 0x4d9   : > { %v2175_v42 = vpop.eup %2174 }
 0x4da   : > { %v2177_v43 = vpop.eup %2176  ;;  %1051 = vmatprep.subr.bf16.mxu0 %v2175_v42 }
 0x4db   : > { %v2179_v46 = vpop.eup %2178  ;;  %1104 = vmatprep.subr.bf16.mxu1 %v2177_v43  ;;  %1052 = vmatpush1.bf16.msra.mxu0 %v2173_v41 }
 0x4dc   : > { %1105 = vmatpush1.bf16.msra.mxu1 %v2179_v46 }
 0x4de   : > { %2030 = vmatmul.mubr.msk.bf16.vlgmr.msra.gmra.mrb[40].mxu0 %vm554_vm2, %v2493_v20 }
 0x4df   : > { %2032 = vmatmul.mubr.msk.bf16.vlgmr.msra.gmra.mrb[40].mxu1 %vm554_vm2, %v2493_v20  ;;  %1091 = vmatprep.mubr.bf16.mxu0 %v2342_v5 }
 0x4e0   : > { %1144 = vmatprep.mubr.bf16.mxu1 %v2342_v5 }
 0x4e6   : > { %2031 = vmatmul.mubr.msk.bf16.gmra.mrb[44].mxu0 %vm554_vm2, %v2504_v21 }
 0x4e7   : > { %2033 = vmatmul.mubr.msk.bf16.gmra.mrb[44].mxu1 %vm554_vm2, %v2504_v21  ;;  %1203 = vmatprep.mubr.bf16.mxu0 %v2342_v5 }
 0x4e8   : > { %1256 = vmatprep.mubr.bf16.mxu1 %v2342_v5 }
 0x5b1   : > { %v1083_v47 = vpop.f32.mrb[40].mxu0 }
 0x5b2   : > { %v1136_v48 = vpop.f32.mrb[40].mxu1  ;;  %v1085_v49 = vpop.f32.mrb[41].mxu0  ;;  %v1084_v52 = vadd.f32 %v1083_v47, %v2512_v22 }
 0x5b3   : > { %v1138_v50 = vpop.f32.mrb[41].mxu1  ;;  %v1087_v51 = vpop.f32.mrb[42].mxu0  ;;  %v1137_v56 = vadd.f32 %v1136_v48, %v2512_v22  ;;  %v1086_v57 = vadd.f32 %v1085_v49, %v2512_v22 }
 0x5b4   : > { %v1088_v53 = vadd.f32 %v1087_v51, %v2514_v23  ;;  %v1140_v54 = vpop.f32.mrb[42].mxu1  ;;  %v1089_v55 = vpop.f32.mrb[43].mxu0  ;;  %v1139_v61 = vadd.f32 %v1138_v50, %v2512_v22 }
 0x5b5   : > { %v1141_v58 = vadd.f32 %v1140_v54, %v2514_v23  ;;  %v1090_v59 = vadd.f32 %v1089_v55, %v2514_v23  ;;  %v1142_v60 = vpop.f32.mrb[43].mxu1 }
 0x5b6   : > { %v1155_v62 = vpack.c.bf16 %v1088_v53, %v1084_v52  ;;  %v1143_v63 = vadd.f32 %v1142_v60, %v2514_v23 }
 0x5b7   : > { %v1157_v0 = vpack.c.bf16 %v1141_v58, %v1137_v56  ;;  %v1156_v1 = vpack.c.bf16 %v1090_v59, %v1086_v57 }
 0x5b8   : > { %v1158_v2 = vpack.c.bf16 %v1143_v63, %v1139_v61  ;;  %2180 = vtanh.bf16 %v1155_v62 }
 0x5b9   : > { %v1093_v3 = vpop.f32.mrb[44].mxu0  ;;  %2182 = vtanh.bf16 %v1156_v1 }
 0x5ba   : > { %v1146_v4 = vpop.f32.mrb[44].mxu1  ;;  %v1095_v6 = vpop.f32.mrb[45].mxu0  ;;  %2184 = vtanh.bf16 %v1158_v2  ;;  %v1094_v9 = vadd.f32 %v1093_v3, %v2524_v44 }
 0x5bb   : > { %v1148_v7 = vpop.f32.mrb[45].mxu1  ;;  %v1097_v8 = vpop.f32.mrb[46].mxu0  ;;  %2186 = vtanh.bf16 %v1157_v0  ;;  %v1147_v13 = vadd.f32 %v1146_v4, %v2524_v44  ;;  %v1096_v14 = vadd.f32 %v1095_v6, %v2524_v44 }
 0x5bc   : > { %v1098_v10 = vadd.f32 %v1097_v8, %v2526_v45  ;;  %v1150_v11 = vpop.f32.mrb[46].mxu1  ;;  %v1099_v12 = vpop.f32.mrb[47].mxu0  ;;  %v1149_v18 = vadd.f32 %v1148_v7, %v2524_v44 }
 0x5bd   : > { %v1151_v15 = vadd.f32 %v1150_v11, %v2526_v45  ;;  %v1100_v16 = vadd.f32 %v1099_v12, %v2526_v45  ;;  %v1152_v17 = vpop.f32.mrb[47].mxu1 }
 0x5be   : > { %v1159_v19 = vpack.c.bf16 %v1098_v10, %v1094_v9  ;;  %v1153_v24 = vadd.f32 %v1152_v17, %v2526_v45 }
 0x5bf   : > { %v1161_v25 = vpack.c.bf16 %v1151_v15, %v1147_v13  ;;  %v1160_v26 = vpack.c.bf16 %v1100_v16, %v1096_v14 }
 0x5c0   : > { %v1162_v27 = vpack.c.bf16 %v1153_v24, %v1149_v18  ;;  %2188 = vtanh.bf16 %v1159_v19 }
 0x5c1   : > { %2190 = vtanh.bf16 %v1160_v26 }
 0x5c2   : > { %2192 = vtanh.bf16 %v1162_v27 }
 0x5c3   : > { %v2181_v28 = vpop.eup %2180  ;;  %2194 = vtanh.bf16 %v1161_v25 }
 0x5c4   : > { %v2183_v29 = vpop.eup %2182 }
 0x5c5   : > { %v2185_v30 = vpop.eup %2184  ;;  %1171 = vmatprep.subr.bf16.mxu0 %v2183_v29 }
 0x5c6   : > { %v2187_v31 = vpop.eup %2186  ;;  %1224 = vmatprep.subr.bf16.mxu1 %v2185_v30  ;;  %1172 = vmatpush1.bf16.msra.mxu0 %v2181_v28 }
 0x5c7   : > { %1225 = vmatpush1.bf16.msra.mxu1 %v2187_v31 }
 0x5cb   : > { %v2189_v32 = vpop.eup %2188 }
 0x5cc   : > { %v2191_v33 = vpop.eup %2190 }
 0x5cd   : > { %v2193_v34 = vpop.eup %2192  ;;  %1173 = vmatprep.subr.bf16.mxu0 %v2191_v33 }
 0x5ce   : > { %v2195_v35 = vpop.eup %2194  ;;  %1226 = vmatprep.subr.bf16.mxu1 %v2193_v34  ;;  %1174 = vmatpush1.bf16.msra.mxu0 %v2189_v32 }
 0x5cf   : > { %1227 = vmatpush1.bf16.msra.mxu1 %v2195_v35 }
 0x5d1   : > { %2034 = vmatmul.mubr.msk.bf16.vlgmr.msra.gmra.mrb[48].mxu0 %vm554_vm2, %v2493_v20 }
 0x5d2   : > { %2036 = vmatmul.mubr.msk.bf16.vlgmr.msra.gmra.mrb[48].mxu1 %vm554_vm2, %v2493_v20  ;;  %1213 = vmatprep.mubr.bf16.mxu0 %v2342_v5 }
 0x5d3   : > { %1266 = vmatprep.mubr.bf16.mxu1 %v2342_v5 }
 0x5d9   : > { %2035 = vmatmul.mubr.msk.bf16.gmra.mrb[52].mxu0 %vm554_vm2, %v2504_v21 }
 0x5da   : > { %2037 = vmatmul.mubr.msk.bf16.gmra.mrb[52].mxu1 %vm554_vm2, %v2504_v21  ;;  %1325 = vmatprep.mubr.bf16.mxu0 %v2342_v5 }
 0x5db   : > { %1378 = vmatprep.mubr.bf16.mxu1 %v2342_v5 }
 0x6a4   : > { %v1205_v36 = vpop.f32.mrb[48].mxu0 }
 0x6a5   : > { %v1258_v37 = vpop.f32.mrb[48].mxu1  ;;  %v1207_v38 = vpop.f32.mrb[49].mxu0  ;;  %v1206_v41 = vadd.f32 %v1205_v36, %v2512_v22 }
 0x6a6   : > { %v1260_v39 = vpop.f32.mrb[49].mxu1  ;;  %v1209_v40 = vpop.f32.mrb[50].mxu0  ;;  %v1259_v47 = vadd.f32 %v1258_v37, %v2512_v22  ;;  %v1208_v48 = vadd.f32 %v1207_v38, %v2512_v22 }
 0x6a7   : > { %v1210_v42 = vadd.f32 %v1209_v40, %v2514_v23  ;;  %v1262_v43 = vpop.f32.mrb[50].mxu1  ;;  %v1211_v46 = vpop.f32.mrb[51].mxu0  ;;  %v1261_v52 = vadd.f32 %v1260_v39, %v2512_v22 }
 0x6a8   : > { %v1263_v49 = vadd.f32 %v1262_v43, %v2514_v23  ;;  %v1212_v50 = vadd.f32 %v1211_v46, %v2514_v23  ;;  %v1264_v51 = vpop.f32.mrb[51].mxu1 }
 0x6a9   : > { %v1277_v53 = vpack.c.bf16 %v1210_v42, %v1206_v41  ;;  %v1265_v54 = vadd.f32 %v1264_v51, %v2514_v23 }
 0x6aa   : > { %v1279_v55 = vpack.c.bf16 %v1263_v49, %v1259_v47  ;;  %v1278_v56 = vpack.c.bf16 %v1212_v50, %v1208_v48 }
 0x6ab   : > { %v1280_v57 = vpack.c.bf16 %v1265_v54, %v1261_v52  ;;  %2196 = vtanh.bf16 %v1277_v53 }
 0x6ac   : > { %v1215_v58 = vpop.f32.mrb[52].mxu0  ;;  %2198 = vtanh.bf16 %v1278_v56 }
 0x6ad   : > { %v1268_v59 = vpop.f32.mrb[52].mxu1  ;;  %v1217_v60 = vpop.f32.mrb[53].mxu0  ;;  %2200 = vtanh.bf16 %v1280_v57  ;;  %v1216_v63 = vadd.f32 %v1215_v58, %v2524_v44 }
 0x6ae   : > { %v1270_v61 = vpop.f32.mrb[53].mxu1  ;;  %v1219_v62 = vpop.f32.mrb[54].mxu0  ;;  %2202 = vtanh.bf16 %v1279_v55  ;;  %v1269_v3 = vadd.f32 %v1268_v59, %v2524_v44  ;;  %v1218_v4 = vadd.f32 %v1217_v60, %v2524_v44 }
 0x6af   : > { %v1220_v0 = vadd.f32 %v1219_v62, %v2526_v45  ;;  %v1272_v1 = vpop.f32.mrb[54].mxu1  ;;  %v1221_v2 = vpop.f32.mrb[55].mxu0  ;;  %v1271_v9 = vadd.f32 %v1270_v61, %v2524_v44 }
 0x6b0   : > { %v1273_v6 = vadd.f32 %v1272_v1, %v2526_v45  ;;  %v1222_v7 = vadd.f32 %v1221_v2, %v2526_v45  ;;  %v1274_v8 = vpop.f32.mrb[55].mxu1 }
 0x6b1   : > { %v1281_v10 = vpack.c.bf16 %v1220_v0, %v1216_v63  ;;  %v1275_v11 = vadd.f32 %v1274_v8, %v2526_v45 }
 0x6b2   : > { %v1283_v12 = vpack.c.bf16 %v1273_v6, %v1269_v3  ;;  %v1282_v13 = vpack.c.bf16 %v1222_v7, %v1218_v4 }
 0x6b3   : > { %v1284_v14 = vpack.c.bf16 %v1275_v11, %v1271_v9  ;;  %2204 = vtanh.bf16 %v1281_v10 }
 0x6b4   : > { %2206 = vtanh.bf16 %v1282_v13  ;;  %v2707_v13 = vld [vmem:[%s2856_s3] sm:$0xff]  }
 0x6b5   : > { %2208 = vtanh.bf16 %v1284_v14 }
 0x6b6   : > { %v2197_v15 = vpop.eup %2196  ;;  %2210 = vtanh.bf16 %v1283_v12 }
 0x6b7   : > { %v2199_v16 = vpop.eup %2198 }
 0x6b8   : > { %v2201_v17 = vpop.eup %2200  ;;  %1293 = vmatprep.subr.bf16.mxu0 %v2199_v16 }
 0x6b9   : > { %v2203_v18 = vpop.eup %2202  ;;  %1346 = vmatprep.subr.bf16.mxu1 %v2201_v17  ;;  %1294 = vmatpush1.bf16.msra.mxu0 %v2197_v15 }
 0x6ba   : > { %1347 = vmatpush1.bf16.msra.mxu1 %v2203_v18 }
 0x6be   : > { %v2205_v19 = vpop.eup %2204 }
 0x6bf   : > { %v2207_v24 = vpop.eup %2206 }
 0x6c0   : > { %v2209_v25 = vpop.eup %2208  ;;  %1295 = vmatprep.subr.bf16.mxu0 %v2207_v24 }
 0x6c1   : > { %v2211_v26 = vpop.eup %2210  ;;  %1348 = vmatprep.subr.bf16.mxu1 %v2209_v25  ;;  %1296 = vmatpush1.bf16.msra.mxu0 %v2205_v19 }
 0x6c2   : > { %1349 = vmatpush1.bf16.msra.mxu1 %v2211_v26 }
 0x6c4   : > { %2038 = vmatmul.mubr.msk.bf16.vlgmr.msra.gmra.mrb[56].mxu0 %vm554_vm2, %v2493_v20 }
 0x6c5   : > { %2040 = vmatmul.mubr.msk.bf16.vlgmr.msra.gmra.mrb[56].mxu1 %vm554_vm2, %v2493_v20  ;;  %1335 = vmatprep.mubr.bf16.mxu0 %v2342_v5 }
 0x6c6   : > { %1388 = vmatprep.mubr.bf16.mxu1 %v2342_v5 }
 0x6cc   : > { %2039 = vmatmul.mubr.msk.bf16.gmra.mrb[60].mxu0 %vm554_vm2, %v2504_v21 }
 0x6cd   : > { %2041 = vmatmul.mubr.msk.bf16.gmra.mrb[60].mxu1 %vm554_vm2, %v2504_v21  ;;  %1447 = vmatprep.mubr.bf16.mxu0 %v2342_v5 }
 0x6ce   : > { %1500 = vmatprep.mubr.bf16.mxu1 %v2342_v5 }
 0x797   : > { %v1327_v27 = vpop.f32.mrb[56].mxu0 }
 0x798   : > { %v1380_v28 = vpop.f32.mrb[56].mxu1  ;;  %v1329_v29 = vpop.f32.mrb[57].mxu0  ;;  %v1328_v20 = vadd.f32 %v1327_v27, %v2512_v22 }
 0x799   : > { %v1382_v30 = vpop.f32.mrb[57].mxu1  ;;  %v1331_v31 = vpop.f32.mrb[58].mxu0  ;;  %v1381_v35 = vadd.f32 %v1380_v28, %v2512_v22  ;;  %v1330_v36 = vadd.f32 %v1329_v29, %v2512_v22 }
 0x79a   : > { %v1332_v32 = vadd.f32 %v1331_v31, %v2514_v23  ;;  %v1384_v33 = vpop.f32.mrb[58].mxu1  ;;  %v1333_v34 = vpop.f32.mrb[59].mxu0  ;;  %v1383_v40 = vadd.f32 %v1382_v30, %v2512_v22 }
 0x79b   : > { %v1385_v37 = vadd.f32 %v1384_v33, %v2514_v23  ;;  %v1334_v38 = vadd.f32 %v1333_v34, %v2514_v23  ;;  %v1386_v39 = vpop.f32.mrb[59].mxu1 }
 0x79c   : > { %v1399_v41 = vpack.c.bf16 %v1332_v32, %v1328_v20  ;;  %v1387_v42 = vadd.f32 %v1386_v39, %v2514_v23 }
 0x79d   : > { %v1401_v43 = vpack.c.bf16 %v1385_v37, %v1381_v35  ;;  %v1400_v46 = vpack.c.bf16 %v1334_v38, %v1330_v36 }
 0x79e   : > { %v1402_v47 = vpack.c.bf16 %v1387_v42, %v1383_v40  ;;  %2212 = vtanh.bf16 %v1399_v41 }
 0x79f   : > { %v1337_v48 = vpop.f32.mrb[60].mxu0  ;;  %2214 = vtanh.bf16 %v1400_v46 }
 0x7a0   : > { %v1390_v49 = vpop.f32.mrb[60].mxu1  ;;  %v1339_v50 = vpop.f32.mrb[61].mxu0  ;;  %2216 = vtanh.bf16 %v1402_v47  ;;  %v1338_v53 = vadd.f32 %v1337_v48, %v2524_v44 }
 0x7a1   : > { %v1392_v51 = vpop.f32.mrb[61].mxu1  ;;  %v1341_v52 = vpop.f32.mrb[62].mxu0  ;;  %2218 = vtanh.bf16 %v1401_v43  ;;  %v1391_v57 = vadd.f32 %v1390_v49, %v2524_v44  ;;  %v1340_v58 = vadd.f32 %v1339_v50, %v2524_v44 }
 0x7a2   : > { %v1342_v54 = vadd.f32 %v1341_v52, %v2526_v45  ;;  %v1394_v55 = vpop.f32.mrb[62].mxu1  ;;  %v1343_v56 = vpop.f32.mrb[63].mxu0  ;;  %v1393_v62 = vadd.f32 %v1392_v51, %v2524_v44 }
 0x7a3   : > { %v1395_v59 = vadd.f32 %v1394_v55, %v2526_v45  ;;  %v1344_v60 = vadd.f32 %v1343_v56, %v2526_v45  ;;  %v1396_v61 = vpop.f32.mrb[63].mxu1 }
 0x7a4   : > { %v1403_v63 = vpack.c.bf16 %v1342_v54, %v1338_v53  ;;  %v1397_v0 = vadd.f32 %v1396_v61, %v2526_v45 }
 0x7a5   : > { %v1405_v1 = vpack.c.bf16 %v1395_v59, %v1391_v57  ;;  %v1404_v2 = vpack.c.bf16 %v1344_v60, %v1340_v58 }
 0x7a6   : > { %v1406_v3 = vpack.c.bf16 %v1397_v0, %v1393_v62  ;;  %2220 = vtanh.bf16 %v1403_v63 }
 0x7a7   : > { %2222 = vtanh.bf16 %v1404_v2  ;;  %v2746_v2 = vld [vmem:[%s2856_s3 + $0x8] sm:$0xff]  }
 0x7a8   : > { %2224 = vtanh.bf16 %v1406_v3 }
 0x7a9   : > { %v2213_v4 = vpop.eup %2212  ;;  %2226 = vtanh.bf16 %v1405_v1 }
 0x7aa   : > { %v2215_v6 = vpop.eup %2214 }
 0x7ab   : > { %v2217_v7 = vpop.eup %2216  ;;  %1415 = vmatprep.subr.bf16.mxu0 %v2215_v6 }
 0x7ac   : > { %v2219_v8 = vpop.eup %2218  ;;  %1468 = vmatprep.subr.bf16.mxu1 %v2217_v7  ;;  %1416 = vmatpush1.bf16.msra.mxu0 %v2213_v4 }
 0x7ad   : > { %1469 = vmatpush1.bf16.msra.mxu1 %v2219_v8 }
 0x7b1   : > { %v2221_v9 = vpop.eup %2220 }
 0x7b2   : > { %v2223_v10 = vpop.eup %2222 }
 0x7b3   : > { %v2225_v11 = vpop.eup %2224  ;;  %1417 = vmatprep.subr.bf16.mxu0 %v2223_v10 }
 0x7b4   : > { %v2227_v12 = vpop.eup %2226  ;;  %1470 = vmatprep.subr.bf16.mxu1 %v2225_v11  ;;  %1418 = vmatpush1.bf16.msra.mxu0 %v2221_v9 }
 0x7b5   : > { %1471 = vmatpush1.bf16.msra.mxu1 %v2227_v12 }
 0x7b7   : > { %2042 = vmatmul.mubr.msk.bf16.vlgmr.msra.gmra.mrb[64].mxu0 %vm554_vm2, %v2707_v13 }
 0x7b8   : > { %2044 = vmatmul.mubr.msk.bf16.vlgmr.msra.gmra.mrb[64].mxu1 %vm554_vm2, %v2707_v13  ;;  %1457 = vmatprep.mubr.bf16.mxu0 %v2342_v5 }
 0x7b9   : > { %1510 = vmatprep.mubr.bf16.mxu1 %v2342_v5 }
 0x7bf   : > { %2043 = vmatmul.mubr.msk.bf16.gmra.mrb[68].mxu0 %vm554_vm2, %v2504_v21 }
 0x7c0   : > { %2045 = vmatmul.mubr.msk.bf16.gmra.mrb[68].mxu1 %vm554_vm2, %v2504_v21  ;;  %1569 = vmatprep.mubr.bf16.mxu0 %v2342_v5 }
 0x7c1   : > { %1622 = vmatprep.mubr.bf16.mxu1 %v2342_v5 }
 0x88a   : > { %v1449_v14 = vpop.f32.mrb[64].mxu0 }
 0x88b   : > { %v1502_v15 = vpop.f32.mrb[64].mxu1  ;;  %v1451_v16 = vpop.f32.mrb[65].mxu0  ;;  %v1450_v19 = vadd.f32 %v1449_v14, %v2512_v22 }
 0x88c   : > { %v1504_v17 = vpop.f32.mrb[65].mxu1  ;;  %v1453_v18 = vpop.f32.mrb[66].mxu0  ;;  %v1503_v27 = vadd.f32 %v1502_v15, %v2512_v22  ;;  %v1452_v28 = vadd.f32 %v1451_v16, %v2512_v22 }
 0x88d   : > { %v1454_v24 = vadd.f32 %v1453_v18, %v2514_v23  ;;  %v1506_v25 = vpop.f32.mrb[66].mxu1  ;;  %v1455_v26 = vpop.f32.mrb[67].mxu0  ;;  %v1505_v31 = vadd.f32 %v1504_v17, %v2512_v22 }
 0x88e   : > { %v1507_v21 = vadd.f32 %v1506_v25, %v2514_v23  ;;  %v1456_v29 = vadd.f32 %v1455_v26, %v2514_v23  ;;  %v1508_v30 = vpop.f32.mrb[67].mxu1 }
 0x88f   : > { %v1521_v20 = vpack.c.bf16 %v1454_v24, %v1450_v19  ;;  %v1509_v32 = vadd.f32 %v1508_v30, %v2514_v23 }
 0x890   : > { %v1523_v33 = vpack.c.bf16 %v1507_v21, %v1503_v27  ;;  %v1522_v34 = vpack.c.bf16 %v1456_v29, %v1452_v28 }
 0x891   : > { %v1524_v35 = vpack.c.bf16 %v1509_v32, %v1505_v31  ;;  %2228 = vtanh.bf16 %v1521_v20 }
 0x892   : > { %v1459_v36 = vpop.f32.mrb[68].mxu0  ;;  %2230 = vtanh.bf16 %v1522_v34 }
 0x893   : > { %v1512_v37 = vpop.f32.mrb[68].mxu1  ;;  %v1461_v38 = vpop.f32.mrb[69].mxu0  ;;  %2232 = vtanh.bf16 %v1524_v35  ;;  %v1460_v41 = vadd.f32 %v1459_v36, %v2524_v44 }
 0x894   : > { %v1514_v39 = vpop.f32.mrb[69].mxu1  ;;  %v1463_v40 = vpop.f32.mrb[70].mxu0  ;;  %2234 = vtanh.bf16 %v1523_v33  ;;  %v1513_v47 = vadd.f32 %v1512_v37, %v2524_v44  ;;  %v1462_v48 = vadd.f32 %v1461_v38, %v2524_v44 }
 0x895   : > { %v1464_v42 = vadd.f32 %v1463_v40, %v2526_v45  ;;  %v1516_v43 = vpop.f32.mrb[70].mxu1  ;;  %v1465_v46 = vpop.f32.mrb[71].mxu0  ;;  %v1515_v52 = vadd.f32 %v1514_v39, %v2524_v44 }
 0x896   : > { %v1517_v49 = vadd.f32 %v1516_v43, %v2526_v45  ;;  %v1466_v50 = vadd.f32 %v1465_v46, %v2526_v45  ;;  %v1518_v51 = vpop.f32.mrb[71].mxu1 }
 0x897   : > { %v1525_v53 = vpack.c.bf16 %v1464_v42, %v1460_v41  ;;  %v1519_v54 = vadd.f32 %v1518_v51, %v2526_v45 }
 0x898   : > { %v1527_v55 = vpack.c.bf16 %v1517_v49, %v1513_v47  ;;  %v1526_v56 = vpack.c.bf16 %v1466_v50, %v1462_v48 }
 0x899   : > { %v1528_v57 = vpack.c.bf16 %v1519_v54, %v1515_v52  ;;  %2236 = vtanh.bf16 %v1525_v53 }
 0x89a   : > { %2238 = vtanh.bf16 %v1526_v56 }
 0x89b   : > { %2240 = vtanh.bf16 %v1528_v57 }
 0x89c   : > { %v2229_v58 = vpop.eup %2228  ;;  %2242 = vtanh.bf16 %v1527_v55 }
 0x89d   : > { %v2231_v59 = vpop.eup %2230 }
 0x89e   : > { %v2233_v60 = vpop.eup %2232  ;;  %1537 = vmatprep.subr.bf16.mxu0 %v2231_v59 }
 0x89f   : > { %v2235_v61 = vpop.eup %2234  ;;  %1590 = vmatprep.subr.bf16.mxu1 %v2233_v60  ;;  %1538 = vmatpush1.bf16.msra.mxu0 %v2229_v58 }
 0x8a0   : > { %1591 = vmatpush1.bf16.msra.mxu1 %v2235_v61 }
 0x8a4   : > { %v2237_v62 = vpop.eup %2236 }
 0x8a5   : > { %v2239_v63 = vpop.eup %2238 }
 0x8a6   : > { %v2241_v0 = vpop.eup %2240  ;;  %1539 = vmatprep.subr.bf16.mxu0 %v2239_v63 }
 0x8a7   : > { %v2243_v1 = vpop.eup %2242  ;;  %1592 = vmatprep.subr.bf16.mxu1 %v2241_v0  ;;  %1540 = vmatpush1.bf16.msra.mxu0 %v2237_v62 }
 0x8a8   : > { %1593 = vmatpush1.bf16.msra.mxu1 %v2243_v1 }
 0x8aa   : > { %2046 = vmatmul.mubr.msk.bf16.vlgmr.msra.gmra.mrb[72].mxu0 %vm554_vm2, %v2707_v13 }
 0x8ab   : > { %2048 = vmatmul.mubr.msk.bf16.vlgmr.msra.gmra.mrb[72].mxu1 %vm554_vm2, %v2707_v13  ;;  %1579 = vmatprep.mubr.bf16.mxu0 %v2342_v5 }
 0x8ac   : > { %1632 = vmatprep.mubr.bf16.mxu1 %v2342_v5 }
 0x8b2   : > { %2047 = vmatmul.mubr.msk.bf16.gmra.mrb[76].mxu0 %vm554_vm2, %v2746_v2 }
 0x8b3   : > { %2049 = vmatmul.mubr.msk.bf16.gmra.mrb[76].mxu1 %vm554_vm2, %v2746_v2  ;;  %1691 = vmatprep.mubr.bf16.mxu0 %v2342_v5 }
 0x8b4   : > { %1744 = vmatprep.mubr.bf16.mxu1 %v2342_v5 }
 0x97d   : > { %v1571_v3 = vpop.f32.mrb[72].mxu0 }
 0x97e   : > { %v1624_v4 = vpop.f32.mrb[72].mxu1  ;;  %v1573_v6 = vpop.f32.mrb[73].mxu0  ;;  %v1572_v9 = vadd.f32 %v1571_v3, %v2512_v22 }
 0x97f   : > { %v1626_v7 = vpop.f32.mrb[73].mxu1  ;;  %v1575_v8 = vpop.f32.mrb[74].mxu0  ;;  %v1625_v14 = vadd.f32 %v1624_v4, %v2512_v22  ;;  %v1574_v15 = vadd.f32 %v1573_v6, %v2512_v22 }
 0x980   : > { %v1576_v10 = vadd.f32 %v1575_v8, %v2514_v23  ;;  %v1628_v11 = vpop.f32.mrb[74].mxu1  ;;  %v1577_v12 = vpop.f32.mrb[75].mxu0  ;;  %v1627_v19 = vadd.f32 %v1626_v7, %v2512_v22 }
 0x981   : > { %v1629_v16 = vadd.f32 %v1628_v11, %v2514_v23  ;;  %v1578_v17 = vadd.f32 %v1577_v12, %v2514_v23  ;;  %v1630_v18 = vpop.f32.mrb[75].mxu1 }
 0x982   : > { %v1643_v24 = vpack.c.bf16 %v1576_v10, %v1572_v9  ;;  %v1631_v25 = vadd.f32 %v1630_v18, %v2514_v23 }
 0x983   : > { %v1645_v26 = vpack.c.bf16 %v1629_v16, %v1625_v14  ;;  %v1644_v27 = vpack.c.bf16 %v1578_v17, %v1574_v15 }
 0x984   : > { %v1646_v28 = vpack.c.bf16 %v1631_v25, %v1627_v19  ;;  %2244 = vtanh.bf16 %v1643_v24 }
 0x985   : > { %v1581_v21 = vpop.f32.mrb[76].mxu0  ;;  %2246 = vtanh.bf16 %v1644_v27 }
 0x986   : > { %v1634_v29 = vpop.f32.mrb[76].mxu1  ;;  %v1583_v30 = vpop.f32.mrb[77].mxu0  ;;  %2248 = vtanh.bf16 %v1646_v28  ;;  %v1582_v32 = vadd.f32 %v1581_v21, %v2524_v44 }
 0x987   : > { %v1636_v31 = vpop.f32.mrb[77].mxu1  ;;  %v1585_v20 = vpop.f32.mrb[78].mxu0  ;;  %2250 = vtanh.bf16 %v1645_v26  ;;  %v1635_v36 = vadd.f32 %v1634_v29, %v2524_v44  ;;  %v1584_v37 = vadd.f32 %v1583_v30, %v2524_v44 }
 0x988   : > { %v1586_v33 = vadd.f32 %v1585_v20, %v2526_v45  ;;  %v1638_v34 = vpop.f32.mrb[78].mxu1  ;;  %v1587_v35 = vpop.f32.mrb[79].mxu0  ;;  %v1637_v41 = vadd.f32 %v1636_v31, %v2524_v44 }
 0x989   : > { %v1639_v38 = vadd.f32 %v1638_v34, %v2526_v45  ;;  %v1588_v39 = vadd.f32 %v1587_v35, %v2526_v45  ;;  %v1640_v40 = vpop.f32.mrb[79].mxu1 }
 0x98a   : > { %v1647_v42 = vpack.c.bf16 %v1586_v33, %v1582_v32  ;;  %v1641_v43 = vadd.f32 %v1640_v40, %v2526_v45  ;;  %v1788_v40 = vlaneseq }
 0x98b   : > { %v1649_v46 = vpack.c.bf16 %v1639_v38, %v1635_v36  ;;  %v1648_v47 = vpack.c.bf16 %v1588_v39, %v1584_v37  ;;  %v1781_v39 = vld [vmem:[%s2858_s5] sm:$0x1] }
 0x98c   : > { %v1650_v48 = vpack.c.bf16 %v1641_v43, %v1637_v41  ;;  %2252 = vtanh.bf16 %v1647_v42  ;;  %v1789_v41 = vshrl.u32 %v1788_v40, 7  ;;  %v2343_v42 = vmov 1966171168  }
 0x98d   : > { %2254 = vtanh.bf16 %v1648_v47  ;;  %v1884_v43 = vunpack.c.l.s4 %v2343_v42  ;;  %v1786_v47 = vpop.permute.xlu0 %1785  ;;  %vm1908_vm3 = vcmp.lt.s32.totalorder %v1788_v40, 512 }
 0x98e   : > { %2256 = vtanh.bf16 %v1650_v48 }
 0x98f   : > { %v2245_v49 = vpop.eup %2244  ;;  %2258 = vtanh.bf16 %v1649_v46  ;;  %v1790_v46 = vsub.s32 0, %v1789_v41  ;;  %v1885_v48 = vunpack.c.0.s8 %v1884_v43 }
 0x990   : > { %v2247_v50 = vpop.eup %2246 }
 0x991   : > { %v2249_v51 = vpop.eup %2248  ;;  %1659 = vmatprep.subr.bf16.mxu0 %v2247_v50 }
 0x992   : > { %v2251_v52 = vpop.eup %2250  ;;  %1712 = vmatprep.subr.bf16.mxu1 %v2249_v51  ;;  %1660 = vmatpush1.bf16.msra.mxu0 %v2245_v49  ;;  %v1791_v49 = vrot.slane %v1786_v47, %v1790_v46 }
 0x993   : > { %1713 = vmatpush1.bf16.msra.mxu1 %v2251_v52 }
 0x997   : > { %v2253_v53 = vpop.eup %2252 }
 0x998   : > { %v2255_v54 = vpop.eup %2254 }
 0x999   : > { %v2257_v55 = vpop.eup %2256  ;;  %1661 = vmatprep.subr.bf16.mxu0 %v2255_v54  ;;  %v1888_v54 = vsub.s32 %v1885_v48, %v1789_v41 }
 0x99a   : > { %v2259_v56 = vpop.eup %2258  ;;  %1714 = vmatprep.subr.bf16.mxu1 %v2257_v55  ;;  %1662 = vmatpush1.bf16.msra.mxu0 %v2253_v53 }
 0x99b   : > { %1715 = vmatpush1.bf16.msra.mxu1 %v2259_v56 }
 0x99d   : > { %2050 = vmatmul.mubr.msk.bf16.vlgmr.msra.gmra.mrb[80].mxu0 %vm554_vm2, %v2707_v13 }
 0x99e   : > { %2052 = vmatmul.mubr.msk.bf16.vlgmr.msra.gmra.mrb[80].mxu1 %vm554_vm2, %v2707_v13  ;;  %1701 = vmatprep.mubr.bf16.mxu0 %v2342_v5 }
 0x99f   : > { %1754 = vmatprep.mubr.bf16.mxu1 %v2342_v5 }
 0x9a5   : > { %2051 = vmatmul.mubr.msk.bf16.gmra.mrb[84].mxu0 %vm554_vm2, %v2746_v2 }
 0x9a6   : > { %2053 = vmatmul.mubr.msk.bf16.gmra.mrb[84].mxu1 %vm554_vm2, %v2746_v2  ;;  %1827 = vmatprep.mubr.bf16.mxu0 %v2342_v5 }
 0x9a7   : > { %1868 = vmatprep.mubr.bf16.mxu1 %v2342_v5 }
 0xa70   : > { %v1693_v57 = vpop.f32.mrb[80].mxu0 }
 0xa71   : > { %v1746_v58 = vpop.f32.mrb[80].mxu1  ;;  %v1695_v59 = vpop.f32.mrb[81].mxu0  ;;  %v1694_v13 = vadd.f32 %v1693_v57, %v2512_v22 }
 0xa72   : > { %v1748_v60 = vpop.f32.mrb[81].mxu1  ;;  %v1697_v61 = vpop.f32.mrb[82].mxu0  ;;  %v1747_v1 = vadd.f32 %v1746_v58, %v2512_v22  ;;  %v1696_v3 = vadd.f32 %v1695_v59, %v2512_v22 }
 0xa73   : > { %v1698_v62 = vadd.f32 %v1697_v61, %v2514_v23  ;;  %v1750_v63 = vpop.f32.mrb[82].mxu1  ;;  %v1699_v0 = vpop.f32.mrb[83].mxu0  ;;  %v1749_v6 = vadd.f32 %v1748_v60, %v2512_v22 }
 0xa74   : > { %v1751_v2 = vadd.f32 %v1750_v63, %v2514_v23  ;;  %v1700_v4 = vadd.f32 %v1699_v0, %v2514_v23  ;;  %v1752_v5 = vpop.f32.mrb[83].mxu1 }
 0xa75   : > { %v1765_v7 = vpack.c.bf16 %v1698_v62, %v1694_v13  ;;  %v1753_v8 = vadd.f32 %v1752_v5, %v2514_v23 }
 0xa76   : > { %v1767_v9 = vpack.c.bf16 %v1751_v2, %v1747_v1  ;;  %v1766_v10 = vpack.c.bf16 %v1700_v4, %v1696_v3 }
 0xa77   : > { %v1768_v11 = vpack.c.bf16 %v1753_v8, %v1749_v6  ;;  %2260 = vtanh.bf16 %v1765_v7 }
 0xa78   : > { %v1703_v12 = vpop.f32.mrb[84].mxu0  ;;  %2262 = vtanh.bf16 %v1766_v10 }
 0xa79   : > { %v1756_v14 = vpop.f32.mrb[84].mxu1  ;;  %v1705_v15 = vpop.f32.mrb[85].mxu0  ;;  %2264 = vtanh.bf16 %v1768_v11  ;;  %v1704_v18 = vadd.f32 %v1703_v12, %v2524_v44 }
 0xa7a   : > { %v1758_v16 = vpop.f32.mrb[85].mxu1  ;;  %v1707_v17 = vpop.f32.mrb[86].mxu0  ;;  %2266 = vtanh.bf16 %v1767_v9  ;;  %v1757_v23 = vadd.f32 %v1756_v14, %v2524_v44  ;;  %v1706_v25 = vadd.f32 %v1705_v15, %v2524_v44 }
 0xa7b   : > { %v1708_v19 = vadd.f32 %v1707_v17, %v2526_v45  ;;  %v1760_v22 = vpop.f32.mrb[86].mxu1  ;;  %v1709_v24 = vpop.f32.mrb[87].mxu0  ;;  %v1759_v21 = vadd.f32 %v1758_v16, %v2524_v44 }
 0xa7c   : > { %v1761_v26 = vadd.f32 %v1760_v22, %v2526_v45  ;;  %v1710_v27 = vadd.f32 %v1709_v24, %v2526_v45  ;;  %v1762_v28 = vpop.f32.mrb[87].mxu1 }
 0xa7d   : > { %v1769_v29 = vpack.c.bf16 %v1708_v19, %v1704_v18  ;;  %v1763_v30 = vadd.f32 %v1762_v28, %v2526_v45 }
 0xa7e   : > { %v1771_v31 = vpack.c.bf16 %v1761_v26, %v1757_v23  ;;  %v1770_v20 = vpack.c.bf16 %v1710_v27, %v1706_v25 }
 0xa7f   : > { %v1772_v32 = vpack.c.bf16 %v1763_v30, %v1759_v21  ;;  %2268 = vtanh.bf16 %v1769_v29 }
 0xa80   : > { %2270 = vtanh.bf16 %v1770_v20 }
 0xa81   : > { %2272 = vtanh.bf16 %v1772_v32 }
 0xa82   : > { %v2261_v33 = vpop.eup %2260  ;;  %2274 = vtanh.bf16 %v1771_v31 }
 0xa83   : > { %v2263_v34 = vpop.eup %2262 }
 0xa84   : > { %v2265_v35 = vpop.eup %2264  ;;  %1795 = vmatprep.subr.bf16.mxu0 %v2263_v34 }
 0xa85   : > { %v2267_v36 = vpop.eup %2266  ;;  %1836 = vmatprep.subr.bf16.mxu1 %v2265_v35  ;;  %1796 = vmatpush1.bf16.msra.mxu0 %v2261_v33 }
 0xa86   : > { %1837 = vmatpush1.bf16.msra.mxu1 %v2267_v36 }
 0xa8a   : > { %v2269_v37 = vpop.eup %2268 }
 0xa8b   : > { %v2271_v44 = vpop.eup %2270 }
 0xa8c   : > { %v2273_v38 = vpop.eup %2272  ;;  %1797 = vmatprep.subr.bf16.mxu0 %v2271_v44 }
 0xa8d   : > { %v2275_v45 = vpop.eup %2274  ;;  %1838 = vmatprep.subr.bf16.mxu1 %v2273_v38  ;;  %1798 = vmatpush1.bf16.msra.mxu0 %v2269_v37 }
 0xa8e   : > { %1839 = vmatpush1.bf16.msra.mxu1 %v2275_v45 }
 0xa90   : > { %2054 = vmatmul.mubr.msk.bf16.vlgmr.msra.gmra.mrb[88].mxu0 %vm554_vm2, %v1781_v39 }
 0xa91   : > { %2055 = vmatmul.mubr.msk.bf16.vlgmr.msra.gmra.mrb[88].mxu1 %vm554_vm2, %v1781_v39 }
 0xb63   : > { %v1829_v50 = vpop.f32.mrb[88].mxu0 }
 0xb64   : > { %v1830_v51 = vadd.f32 %v1829_v50, %v1791_v49  ;;  %v1870_v52 = vpop.f32.mrb[88].mxu1  ;;  %v1831_v53 = vpop.f32.mrb[89].mxu0 }
 0xb65   : > { %v1871_v55 = vadd.f32 %v1870_v52, %v1791_v49  ;;  %v1832_v56 = vadd.f32 %v1831_v53, %v1791_v49  ;;  %v1872_v57 = vpop.f32.mrb[89].mxu1  ;;  %v1833_v58 = vpop.f32.mrb[90].mxu0 }
 0xb66   : > { %v1873_v59 = vadd.f32 %v1872_v57, %v1791_v49  ;;  %v1874_v60 = vpop.f32.mrb[90].mxu1  ;;  %v1834_v61 = vpop.f32.mrb[91].mxu0 }
 0xb67   : > { %v1881_v13 = vcombine.low %v1830_v51, %v1832_v56  ;;  %v1875_v62 = vpop.f32.mrb[91].mxu1 }
 0xb68   : > { %v1882_v63 = vcombine.low %v1871_v55, %v1873_v59 }
 0xb69   : > { %v1889_v0 = vrot.slane %v1881_v13, %v1888_v54 }
 0xb6a   : > { %v1896_v1 = vrot.slane %v1882_v63, %v1888_v54 }
 0xb6c   : > { %v1897_v3 = vcombine.low %v1889_v0, %v1896_v1 }
 0xb6e   : > { %v1904_v2 = vrot.slane %v1897_v3, %v1888_v54 }
 0xb70   : > { %1910 = vst.msk [vmem:[%s304_s10] sm:$0xf] %vm1908_vm3, %v1904_v2 }
 0xb71   : > { %2291 = shalt.err (!%p2288_p5)
}
 0xb72   : > { %s2292_s21 = scalar_lea.hbm %s2809_s17, 64  ;;  %s2296_s25 = scalar_lea.hbm %s2860_s7, 128 }
 0xb73   : > { %p2293_p7 = scmp.ne.s32.totalorder %s2809_s17, %s2292_s21  ;;  %p2297_p12 = scmp.lt.u32.totalorder %s2809_s17, %s2860_s7 }
 0xb74   : > { %p2298_p13 = scmp.lt.u32.totalorder %s2296_s25, %s2292_s21  ;;  %p2300_p1 = scmp.lt.u32.totalorder %s2292_s21, %s2809_s17 }
 0xb75   : > { %p2294_p10 = pnand %p2293_p7, %p2426_p6 }
 0xb76   : > { %p2299_p0 = por %p2298_p13, %p2297_p12 }
 0xb77   : > { %p2295_p11 = pneg %p2294_p10 }
 0xb78   : > { %p2301_p2 = por %p2300_p1, %p2299_p0 }
 0xb7a   : > { %p2302_p3 = pnand %p2301_p2, %p2295_p11 }
 0xb7c   : > { %2305 = shalt.err (!%p2302_p3)
}
 0xb7d   : > { %2063 = dma.vmem_to_hbm [thread:$0]  (%p2426_p6), %s2811_s14, 64, %s2809_s17, %s1912_s18  }
 0xb7e PF: > { %s1938_s10 = sand.u32 1, %s2328_s26   ;;  %p2066_p4 = pnand %p1993_p9, %p2430_p8 }
 0xb7f   : > { %s1939_s15 = scalar_lea.sflag [#allocation5], %s1938_s10 }
 0xb80   : > { %2323 = dma.done.wait (!%p2066_p4), %s1939_s15, 64  }
 0xb81   : > { %2325 = vsyncadd (!%p2066_p4), %s1939_s15, 4294967232  ;;  %p19_p5 = scmp.ge.s32.totalorder %s2411_s8, 4   ;;  %s2863_s26 = smov %s2332_s27 }
 0xb82   : > { %s2864_s27 = smov %s2336_s28  ;;  %s2865_s28 = smov %s2424_s11 }
 0xb83   : > { %s2866_s29 = smov %s2411_s8  ;;  %21 = sbr.rel (!%p19_p5) target bundleno = 6 (0x6), region = 111 }
 0xb8a   :  { %1944 = vsyncpa [#allocation5], 1 }
 0xb8b   :  { %1946 = vsyncpa [#allocation5 + $0x1], 1 }

</bundles_post_ra>
